<compile_context>
chip_gen: v7x
topology: tpu7x:2x2x1
jax: 0.10.0
libtpu: 0.0.40
codegen_flags: <defaults>
</compile_context>

<pallas_src>
import numpy as np

import jax
import jax.numpy as jnp
from jax.experimental import pallas as pl
from jax.experimental.pallas import tpu as pltpu

CONV_K = 5
INPUT_CH = 1
LANES = 128
ROWS_PAD = 16          # 12 pooled rows padded to 16 (2 sublane tiles)
K1 = 256               # conv1 banded-matmul K (140 real rows, zero padded)


# ----------------------------- fused Pallas kernel ---------------------------

def cnn_fused_kernel(p_ref, w1_ref, b1_ref, w2_ref, b2_ref,
                     wf1_ref, bf1_ref, wf2_ref, bf2_ref, wf3_ref, bf3_ref,
                     o_ref):
    """conv1+pool -> conv2+pool -> fc1 -> fc2 -> fc3 for one batch tile."""
    tb = o_ref.shape[0]

    # -- stage 1: conv1 as ONE banded matmul --------------------------------
    # p_ref rows = (b, row-parity, pooled-row), lanes = di*28 + w (raw pixels).
    # Output lanes: [even output column block | odd output column block].
    r = jnp.dot(p_ref[...], w1_ref[...], preferred_element_type=jnp.float32)
    r = r.reshape(tb, 2, ROWS_PAD, 2 * LANES)
    r = jnp.maximum(r[:, 0], r[:, 1])                    # pool over row pairs
    r = jnp.maximum(r[:, :, 0:LANES], r[:, :, LANES:])   # pool over col pairs
    a1 = jnp.maximum(r + b1_ref[...], 0.0)               # (tb, 16, 128) f32
    # a1 lanes 0..71 = (width p)*6 + channel c ; lanes 72..127 are exact zeros.

    # -- stage 2: conv2 as 5 row-tap banded matmuls (K carries 12x6 real) ----
    acc = None
    for di in range(CONV_K):
        lhs = a1[:, di:di + 8, :].reshape(tb * 8, LANES).astype(jnp.bfloat16)
        d = jnp.dot(lhs, w2_ref[di], preferred_element_type=jnp.float32)
        acc = d if acc is None else acc + d              # (tb*8, 256)
    c2 = acc.reshape(tb, 8, 2 * LANES)
    c2 = jnp.maximum(c2[:, :, 0:LANES], c2[:, :, LANES:])   # pool col pairs
    # c2 lanes: j2*16 + co (valid 0..63, rest exact zeros); rows = conv2 row.

    # -- stage 3: row-pair pool + bias + relu; pack fc1 features (K=512) -----
    b2b = jnp.broadcast_to(b2_ref[...], (tb, LANES))     # hoisted broadcast
    chunks = []
    for i2 in range(4):
        v = jnp.maximum(c2[:, 2 * i2, :], c2[:, 2 * i2 + 1, :])
        chunks.append(jnp.maximum(v + b2b, 0.0))
    h = jnp.concatenate(chunks, axis=-1)                 # (tb, 512) f32

    # -- stage 4: fc1 -> relu -> fc2 -> relu -> fc3 (bf16 in, f32 acc) -------
    h = jnp.maximum(
        jnp.dot(h.astype(jnp.bfloat16), wf1_ref[...],
                preferred_element_type=jnp.float32) + bf1_ref[...], 0.0)
    h = jnp.maximum(
        jnp.dot(h.astype(jnp.bfloat16), wf2_ref[...],
                preferred_element_type=jnp.float32) + bf2_ref[...], 0.0)
    o_ref[...] = (jnp.dot(h.astype(jnp.bfloat16), wf3_ref[...],
                          preferred_element_type=jnp.float32) + bf3_ref[...])


# ----------------------------- host-side data prep ---------------------------

def _conv1_row_patches(x):
    """(B,1,28,28) -> (B*2*16, 256) bf16 row-im2col (di-stacked raw rows)."""
    B = x.shape[0]
    img = x[:, 0, :, :]                                   # (B, 28, 28)
    parities = []
    for rp in range(2):
        taps = [img[:, rp + di: rp + di + 24: 2, :] for di in range(CONV_K)]
        parities.append(jnp.concatenate(taps, axis=-1))   # (B, 12, 140)
    p = jnp.stack(parities, axis=1)                       # (B, 2, 12, 140)
    p = jnp.pad(p, ((0, 0), (0, 0), (0, ROWS_PAD - 12), (0, K1 - 140)))
    return p.astype(jnp.bfloat16).reshape(B * 2 * ROWS_PAD, K1)


def _prep_params(params):
    f32, bf16 = jnp.float32, jnp.bfloat16

    # conv1 -> banded weight (256, 256): rows di*28+w, cols [even | odd] column.
    w1c = params["conv1_w"][:, 0, :, :]                   # (c, di, dj)
    a_ = np.arange(2)[:, None, None, None]
    j_ = np.arange(CONV_K)[None, :, None, None]
    w_ = np.arange(28)[None, None, :, None]
    p_ = np.arange(12)[None, None, None, :]
    m1 = jnp.asarray((w_ == 2 * p_ + a_ + j_).astype(np.float32))  # (2,5,28,12)
    band1 = jnp.einsum("ajwp,cdj->adwpc", m1, w1c)        # (2,5,28,12,6)
    w1 = jnp.zeros((K1, 2 * LANES), f32)
    w1 = w1.at[:140, 0:72].set(band1[0].reshape(140, 72))
    w1 = w1.at[:140, LANES:LANES + 72].set(band1[1].reshape(140, 72))
    b1 = jnp.zeros((1, LANES), f32).at[0, :72].set(jnp.tile(params["conv1_b"], 12))

    # conv2 -> per-kernel-row banded weights (5, 128, 256).
    w2c = params["conv2_w"]                               # (co, ci, di, dj)
    h_ = np.arange(2)[:, None, None, None]
    j_ = np.arange(CONV_K)[None, :, None, None]
    p_ = np.arange(12)[None, None, :, None]
    q_ = np.arange(4)[None, None, None, :]
    m2 = jnp.asarray((p_ == 2 * q_ + h_ + j_).astype(np.float32))  # (2,5,12,4)
    band2 = jnp.einsum("hjpq,oidj->hdpiqo", m2, w2c)      # (2,5,12,6,4,16)
    w2 = jnp.zeros((CONV_K, LANES, 2 * LANES), f32)
    w2 = w2.at[:, :72, 0:64].set(band2[0].reshape(CONV_K, 72, 64))
    w2 = w2.at[:, :72, LANES:LANES + 64].set(band2[1].reshape(CONV_K, 72, 64))
    b2 = jnp.zeros((1, LANES), f32).at[0, :64].set(jnp.tile(params["conv2_b"], 4))

    # fc1: feature lane = i2*128 + j2*16 + co  -> (512, 128)
    fw = params["fc1_w"].reshape(120, 16, 4, 4)           # (n, co, i2, j2)
    fw = jnp.transpose(fw, (2, 3, 1, 0)).reshape(4, 64, 120)
    wf1 = jnp.zeros((4, LANES, LANES), f32).at[:, :64, :120].set(fw)
    wf1 = wf1.reshape(4 * LANES, LANES)
    bf1 = jnp.zeros((1, LANES), f32).at[0, :120].set(params["fc1_b"])

    wf2 = jnp.zeros((LANES, LANES), f32).at[:120, :60].set(params["fc2_w"].T)
    bf2 = jnp.zeros((1, LANES), f32).at[0, :60].set(params["fc2_b"])
    wf3 = jnp.zeros((LANES, LANES), f32).at[:60, :10].set(params["fc3_w"].T)
    bf3 = jnp.zeros((1, LANES), f32).at[0, :10].set(params["fc3_b"])

    return (w1.astype(bf16), b1, w2.astype(bf16), b2, wf1.astype(bf16), bf1,
            wf2.astype(bf16), bf2, wf3.astype(bf16), bf3)


def cnn_forward(x, params, *, block_b=8):
    B = x.shape[0]
    nb = -(-B // block_b)
    b_pad = nb * block_b
    if b_pad != B:
        x = jnp.pad(x, ((0, b_pad - B), (0, 0), (0, 0), (0, 0)))

    p = _conv1_row_patches(x)                             # (b_pad*32, 256) bf16
    w1, b1, w2, b2, wf1, bf1, wf2, bf2, wf3, bf3 = _prep_params(params)

    out = pl.pallas_call(
        cnn_fused_kernel,
        out_shape=jax.ShapeDtypeStruct((b_pad, LANES), jnp.float32),
        grid=(nb,),
        in_specs=[
            pl.BlockSpec((block_b * 2 * ROWS_PAD, K1), lambda b: (b, 0)),
            pl.BlockSpec((K1, 2 * LANES), lambda b: (0, 0)),            # w1
            pl.BlockSpec((1, LANES), lambda b: (0, 0)),                 # b1
            pl.BlockSpec((CONV_K, LANES, 2 * LANES), lambda b: (0, 0, 0)),  # w2
            pl.BlockSpec((1, LANES), lambda b: (0, 0)),                 # b2
            pl.BlockSpec((4 * LANES, LANES), lambda b: (0, 0)),         # wf1
            pl.BlockSpec((1, LANES), lambda b: (0, 0)),                 # bf1
            pl.BlockSpec((LANES, LANES), lambda b: (0, 0)),             # wf2
            pl.BlockSpec((1, LANES), lambda b: (0, 0)),                 # bf2
            pl.BlockSpec((LANES, LANES), lambda b: (0, 0)),             # wf3
            pl.BlockSpec((1, LANES), lambda b: (0, 0)),                 # bf3
        ],
        out_specs=pl.BlockSpec((block_b, LANES), lambda b: (b, 0)),
        compiler_params=pltpu.CompilerParams(
            dimension_semantics=("parallel",),
            vmem_limit_bytes=32 * 1024 * 1024),
    )(p, w1, b1, w2, b2, wf1, bf1, wf2, bf2, wf3, bf3)

    return out[:B, :10]        # logits; padding lanes/rows are sliced away


# ----------------------------- reference (plain JAX, f32 highest) ------------

def ref_forward(x, params):
    hp = jax.lax.Precision.HIGHEST

    def conv_block(x, w, b):
        y = jax.lax.conv_general_dilated(
            x, w, (1, 1), "VALID",
            dimension_numbers=("NCHW", "OIHW", "NCHW"), precision=hp)
        y = jnp.maximum(y + b.reshape(1, -1, 1, 1), 0.0)
        B, C, H, W = y.shape
        return y.reshape(B, C, H // 2, 2, W // 2, 2).max(axis=(3, 5))

    x = conv_block(x, params["conv1_w"], params["conv1_b"])
    x = conv_block(x, params["conv2_w"], params["conv2_b"])
    x = x.reshape(x.shape[0], -1)
    x = jnp.maximum(jnp.dot(x, params["fc1_w"].T, precision=hp)
                    + params["fc1_b"], 0.0)
    x = jnp.maximum(jnp.dot(x, params["fc2_w"].T, precision=hp)
                    + params["fc2_b"], 0.0)
    return jnp.dot(x, params["fc3_w"].T, precision=hp) + params["fc3_b"]


# ----------------------------- parameter init --------------------------------

def init_params(key):
    ks = jax.random.split(key, 10)

    def w(k, shape, fan_in):
        return jax.random.normal(k, shape, jnp.float32) / jnp.sqrt(fan_in)

    return {
        # PyTorch shapes: conv (Cout, Cin, K, K); linear (out, in)
        "conv1_w": w(ks[0], (6, INPUT_CH, CONV_K, CONV_K), INPUT_CH * CONV_K * CONV_K),
        "conv1_b": 0.01 * jax.random.normal(ks[1], (6,), jnp.float32),
        "conv2_w": w(ks[2], (16, 6, CONV_K, CONV_K), 6 * CONV_K * CONV_K),
        "conv2_b": 0.01 * jax.random.normal(ks[3], (16,), jnp.float32),
        "fc1_w": w(ks[4], (120, 16 * 4 * 4), 16 * 4 * 4),
        "fc1_b": 0.01 * jax.random.normal(ks[5], (120,), jnp.float32),
        "fc2_w": w(ks[6], (60, 120), 120),
        "fc2_b": 0.01 * jax.random.normal(ks[7], (60,), jnp.float32),
        "fc3_w": w(ks[8], (10, 60), 60),
        "fc3_b": 0.01 * jax.random.normal(ks[9], (10,), jnp.float32),
    }


if __name__ == "__main__":
    key = jax.random.PRNGKey(0)
    pkey, xkey = jax.random.split(key)
    params = init_params(pkey)

    # MNIST-shaped input: fc1 (16*4*4) forces H = W = 28, C = 1. Small batch = 2.
    x = jax.random.normal(xkey, (2, INPUT_CH, 28, 28), jnp.float32)

    out = jax.block_until_ready(jax.jit(cnn_forward)(x, params))
    ref = jax.block_until_ready(ref_forward(x, params))

    assert out.shape == (2, 10), out.shape
    # Kernel runs bf16 MXU passes with f32 accumulation (per perf review), so
    # compare against the f32 reference at a bf16-appropriate tolerance.
    assert jnp.allclose(out, ref, atol=3e-2, rtol=3e-2), (out, ref)
    print("KERNEL_OK")
</pallas_src>

<mosaic_0001>
module attributes {stable_mosaic.version = 11 : i64} {
  func.func @cnn_fused_kernel(%arg0: i32, %arg1: memref<256x256xbf16, #tpu.memory_space<vmem>>, %arg2: memref<256x256xbf16, #tpu.memory_space<vmem>>, %arg3: memref<1x128xf32, #tpu.memory_space<vmem>>, %arg4: memref<5x128x256xbf16, #tpu.memory_space<vmem>>, %arg5: memref<1x128xf32, #tpu.memory_space<vmem>>, %arg6: memref<512x128xbf16, #tpu.memory_space<vmem>>, %arg7: memref<1x128xf32, #tpu.memory_space<vmem>>, %arg8: memref<128x128xbf16, #tpu.memory_space<vmem>>, %arg9: memref<1x128xf32, #tpu.memory_space<vmem>>, %arg10: memref<128x128xbf16, #tpu.memory_space<vmem>>, %arg11: memref<1x128xf32, #tpu.memory_space<vmem>>, %arg12: memref<8x128xf32, #tpu.memory_space<vmem>>) attributes {dimension_semantics = [#tpu.dimension_semantics<parallel>], iteration_bounds = array<i64: 1>, scalar_prefetch = 0 : i64, scratch_operands = 0 : i64, tpu.core_type = #tpu.core_type<tc>, window_params = [{transform_indices = @transform_0, window_bounds = array<i64: 256, 256>}, {pipeline_mode = #tpu.pipeline_mode<synchronous>, transform_indices = @transform_1, window_bounds = array<i64: 256, 256>}, {pipeline_mode = #tpu.pipeline_mode<synchronous>, transform_indices = @transform_2, window_bounds = array<i64: 1, 128>}, {pipeline_mode = #tpu.pipeline_mode<synchronous>, transform_indices = @transform_3, window_bounds = array<i64: 5, 128, 256>}, {pipeline_mode = #tpu.pipeline_mode<synchronous>, transform_indices = @transform_4, window_bounds = array<i64: 1, 128>}, {pipeline_mode = #tpu.pipeline_mode<synchronous>, transform_indices = @transform_5, window_bounds = array<i64: 512, 128>}, {pipeline_mode = #tpu.pipeline_mode<synchronous>, transform_indices = @transform_6, window_bounds = array<i64: 1, 128>}, {pipeline_mode = #tpu.pipeline_mode<synchronous>, transform_indices = @transform_7, window_bounds = array<i64: 128, 128>}, {pipeline_mode = #tpu.pipeline_mode<synchronous>, transform_indices = @transform_8, window_bounds = array<i64: 1, 128>}, {pipeline_mode = #tpu.pipeline_mode<synchronous>, transform_indices = @transform_9, window_bounds = array<i64: 128, 128>}, {pipeline_mode = #tpu.pipeline_mode<synchronous>, transform_indices = @transform_10, window_bounds = array<i64: 1, 128>}, {transform_indices = @transform_11, window_bounds = array<i64: 8, 128>}]} {
    %c0 = arith.constant 0 : index
    %c0_0 = arith.constant 0 : index
    %0 = vector.load %arg1[%c0, %c0_0] : memref<256x256xbf16, #tpu.memory_space<vmem>>, vector<256x256xbf16>
    %c0_1 = arith.constant 0 : index
    %c0_2 = arith.constant 0 : index
    %1 = vector.load %arg2[%c0_1, %c0_2] : memref<256x256xbf16, #tpu.memory_space<vmem>>, vector<256x256xbf16>
    %cst = arith.constant dense<0.000000e+00> : vector<256x256xf32>
    %2 = tpu.matmul %0, %1, %cst {dimension_numbers = #tpu.dot_dimension_numbers<[1], [0], [0], [1], [0, 0, 1, 1], [], []>} : vector<256x256xbf16>, vector<256x256xbf16>, vector<256x256xf32> -> vector<256x256xf32>
    %3 = vector.shape_cast %2 : vector<256x256xf32> to vector<8x2x16x256xf32>
    %4 = vector.extract_strided_slice %3 {offsets = [0, 0, 0, 0], sizes = [8, 1, 16, 256], strides = [1, 1, 1, 1]} : vector<8x2x16x256xf32> to vector<8x1x16x256xf32>
    %5 = vector.shape_cast %4 : vector<8x1x16x256xf32> to vector<8x16x256xf32>
    %6 = vector.extract_strided_slice %3 {offsets = [0, 1, 0, 0], sizes = [8, 1, 16, 256], strides = [1, 1, 1, 1]} : vector<8x2x16x256xf32> to vector<8x1x16x256xf32>
    %7 = vector.shape_cast %6 : vector<8x1x16x256xf32> to vector<8x16x256xf32>
    %8 = arith.maximumf %5, %7 : vector<8x16x256xf32>
    %9 = vector.extract_strided_slice %8 {offsets = [0, 0, 0], sizes = [8, 16, 128], strides = [1, 1, 1]} : vector<8x16x256xf32> to vector<8x16x128xf32>
    %10 = vector.extract_strided_slice %8 {offsets = [0, 0, 128], sizes = [8, 16, 128], strides = [1, 1, 1]} : vector<8x16x256xf32> to vector<8x16x128xf32>
    %11 = arith.maximumf %9, %10 : vector<8x16x128xf32>
    %c0_3 = arith.constant 0 : index
    %c0_4 = arith.constant 0 : index
    %12 = vector.load %arg3[%c0_3, %c0_4] : memref<1x128xf32, #tpu.memory_space<vmem>>, vector<1x128xf32>
    %13 = vector.shape_cast %12 : vector<1x128xf32> to vector<1x1x128xf32>
    %14 = vector.broadcast %13 : vector<1x1x128xf32> to vector<8x16x128xf32>
    %15 = arith.addf %11, %14 : vector<8x16x128xf32>
    %cst_5 = arith.constant 0.000000e+00 : f32
    %16 = vector.broadcast %cst_5 : f32 to vector<8x16x128xf32>
    %17 = arith.maximumf %15, %16 : vector<8x16x128xf32>
    %18 = vector.extract_strided_slice %17 {offsets = [0, 0, 0], sizes = [8, 8, 128], strides = [1, 1, 1]} : vector<8x16x128xf32> to vector<8x8x128xf32>
    %19 = vector.shape_cast %18 : vector<8x8x128xf32> to vector<64x128xf32>
    %20 = arith.truncf %19 : vector<64x128xf32> to vector<64x128xbf16>
    %c0_6 = arith.constant 0 : index
    %c0_7 = arith.constant 0 : index
    %c0_8 = arith.constant 0 : index
    %21 = vector.load %arg4[%c0_6, %c0_7, %c0_8] : memref<5x128x256xbf16, #tpu.memory_space<vmem>>, vector<1x128x256xbf16>
    %22 = vector.shape_cast %21 : vector<1x128x256xbf16> to vector<128x256xbf16>
    %cst_9 = arith.constant dense<0.000000e+00> : vector<64x256xf32>
    %23 = tpu.matmul %20, %22, %cst_9 {dimension_numbers = #tpu.dot_dimension_numbers<[1], [0], [0], [1], [0, 0, 1, 1], [], []>} : vector<64x128xbf16>, vector<128x256xbf16>, vector<64x256xf32> -> vector<64x256xf32>
    %24 = vector.extract_strided_slice %17 {offsets = [0, 1, 0], sizes = [8, 8, 128], strides = [1, 1, 1]} : vector<8x16x128xf32> to vector<8x8x128xf32>
    %25 = vector.shape_cast %24 : vector<8x8x128xf32> to vector<64x128xf32>
    %26 = arith.truncf %25 : vector<64x128xf32> to vector<64x128xbf16>
    %c1 = arith.constant 1 : index
    %c0_10 = arith.constant 0 : index
    %c0_11 = arith.constant 0 : index
    %27 = vector.load %arg4[%c1, %c0_10, %c0_11] : memref<5x128x256xbf16, #tpu.memory_space<vmem>>, vector<1x128x256xbf16>
    %28 = vector.shape_cast %27 : vector<1x128x256xbf16> to vector<128x256xbf16>
    %cst_12 = arith.constant dense<0.000000e+00> : vector<64x256xf32>
    %29 = tpu.matmul %26, %28, %cst_12 {dimension_numbers = #tpu.dot_dimension_numbers<[1], [0], [0], [1], [0, 0, 1, 1], [], []>} : vector<64x128xbf16>, vector<128x256xbf16>, vector<64x256xf32> -> vector<64x256xf32>
    %30 = arith.addf %23, %29 : vector<64x256xf32>
    %31 = vector.extract_strided_slice %17 {offsets = [0, 2, 0], sizes = [8, 8, 128], strides = [1, 1, 1]} : vector<8x16x128xf32> to vector<8x8x128xf32>
    %32 = vector.shape_cast %31 : vector<8x8x128xf32> to vector<64x128xf32>
    %33 = arith.truncf %32 : vector<64x128xf32> to vector<64x128xbf16>
    %c2 = arith.constant 2 : index
    %c0_13 = arith.constant 0 : index
    %c0_14 = arith.constant 0 : index
    %34 = vector.load %arg4[%c2, %c0_13, %c0_14] : memref<5x128x256xbf16, #tpu.memory_space<vmem>>, vector<1x128x256xbf16>
    %35 = vector.shape_cast %34 : vector<1x128x256xbf16> to vector<128x256xbf16>
    %cst_15 = arith.constant dense<0.000000e+00> : vector<64x256xf32>
    %36 = tpu.matmul %33, %35, %cst_15 {dimension_numbers = #tpu.dot_dimension_numbers<[1], [0], [0], [1], [0, 0, 1, 1], [], []>} : vector<64x128xbf16>, vector<128x256xbf16>, vector<64x256xf32> -> vector<64x256xf32>
    %37 = arith.addf %30, %36 : vector<64x256xf32>
    %38 = vector.extract_strided_slice %17 {offsets = [0, 3, 0], sizes = [8, 8, 128], strides = [1, 1, 1]} : vector<8x16x128xf32> to vector<8x8x128xf32>
    %39 = vector.shape_cast %38 : vector<8x8x128xf32> to vector<64x128xf32>
    %40 = arith.truncf %39 : vector<64x128xf32> to vector<64x128xbf16>
    %c3 = arith.constant 3 : index
    %c0_16 = arith.constant 0 : index
    %c0_17 = arith.constant 0 : index
    %41 = vector.load %arg4[%c3, %c0_16, %c0_17] : memref<5x128x256xbf16, #tpu.memory_space<vmem>>, vector<1x128x256xbf16>
    %42 = vector.shape_cast %41 : vector<1x128x256xbf16> to vector<128x256xbf16>
    %cst_18 = arith.constant dense<0.000000e+00> : vector<64x256xf32>
    %43 = tpu.matmul %40, %42, %cst_18 {dimension_numbers = #tpu.dot_dimension_numbers<[1], [0], [0], [1], [0, 0, 1, 1], [], []>} : vector<64x128xbf16>, vector<128x256xbf16>, vector<64x256xf32> -> vector<64x256xf32>
    %44 = arith.addf %37, %43 : vector<64x256xf32>
    %45 = vector.extract_strided_slice %17 {offsets = [0, 4, 0], sizes = [8, 8, 128], strides = [1, 1, 1]} : vector<8x16x128xf32> to vector<8x8x128xf32>
    %46 = vector.shape_cast %45 : vector<8x8x128xf32> to vector<64x128xf32>
    %47 = arith.truncf %46 : vector<64x128xf32> to vector<64x128xbf16>
    %c4 = arith.constant 4 : index
    %c0_19 = arith.constant 0 : index
    %c0_20 = arith.constant 0 : index
    %48 = vector.load %arg4[%c4, %c0_19, %c0_20] : memref<5x128x256xbf16, #tpu.memory_space<vmem>>, vector<1x128x256xbf16>
    %49 = vector.shape_cast %48 : vector<1x128x256xbf16> to vector<128x256xbf16>
    %cst_21 = arith.constant dense<0.000000e+00> : vector<64x256xf32>
    %50 = tpu.matmul %47, %49, %cst_21 {dimension_numbers = #tpu.dot_dimension_numbers<[1], [0], [0], [1], [0, 0, 1, 1], [], []>} : vector<64x128xbf16>, vector<128x256xbf16>, vector<64x256xf32> -> vector<64x256xf32>
    %51 = arith.addf %44, %50 : vector<64x256xf32>
    %52 = vector.shape_cast %51 : vector<64x256xf32> to vector<8x8x256xf32>
    %53 = vector.extract_strided_slice %52 {offsets = [0, 0, 0], sizes = [8, 8, 128], strides = [1, 1, 1]} : vector<8x8x256xf32> to vector<8x8x128xf32>
    %54 = vector.extract_strided_slice %52 {offsets = [0, 0, 128], sizes = [8, 8, 128], strides = [1, 1, 1]} : vector<8x8x256xf32> to vector<8x8x128xf32>
    %55 = arith.maximumf %53, %54 : vector<8x8x128xf32>
    %c0_22 = arith.constant 0 : index
    %c0_23 = arith.constant 0 : index
    %56 = vector.load %arg5[%c0_22, %c0_23] : memref<1x128xf32, #tpu.memory_space<vmem>>, vector<1x128xf32>
    %57 = vector.shape_cast %56 : vector<1x128xf32> to vector<1x128xf32>
    %58 = vector.broadcast %57 : vector<1x128xf32> to vector<8x128xf32>
    %59 = vector.extract_strided_slice %55 {offsets = [0, 0, 0], sizes = [8, 1, 128], strides = [1, 1, 1]} : vector<8x8x128xf32> to vector<8x1x128xf32>
    %60 = vector.shape_cast %59 : vector<8x1x128xf32> to vector<8x128xf32>
    %61 = vector.extract_strided_slice %55 {offsets = [0, 1, 0], sizes = [8, 1, 128], strides = [1, 1, 1]} : vector<8x8x128xf32> to vector<8x1x128xf32>
    %62 = vector.shape_cast %61 : vector<8x1x128xf32> to vector<8x128xf32>
    %63 = arith.maximumf %60, %62 : vector<8x128xf32>
    %64 = arith.addf %63, %58 : vector<8x128xf32>
    %cst_24 = arith.constant 0.000000e+00 : f32
    %65 = vector.broadcast %cst_24 : f32 to vector<8x128xf32>
    %66 = arith.maximumf %64, %65 : vector<8x128xf32>
    %67 = vector.extract_strided_slice %55 {offsets = [0, 2, 0], sizes = [8, 1, 128], strides = [1, 1, 1]} : vector<8x8x128xf32> to vector<8x1x128xf32>
    %68 = vector.shape_cast %67 : vector<8x1x128xf32> to vector<8x128xf32>
    %69 = vector.extract_strided_slice %55 {offsets = [0, 3, 0], sizes = [8, 1, 128], strides = [1, 1, 1]} : vector<8x8x128xf32> to vector<8x1x128xf32>
    %70 = vector.shape_cast %69 : vector<8x1x128xf32> to vector<8x128xf32>
    %71 = arith.maximumf %68, %70 : vector<8x128xf32>
    %72 = arith.addf %71, %58 : vector<8x128xf32>
    %cst_25 = arith.constant 0.000000e+00 : f32
    %73 = vector.broadcast %cst_25 : f32 to vector<8x128xf32>
    %74 = arith.maximumf %72, %73 : vector<8x128xf32>
    %75 = vector.extract_strided_slice %55 {offsets = [0, 4, 0], sizes = [8, 1, 128], strides = [1, 1, 1]} : vector<8x8x128xf32> to vector<8x1x128xf32>
    %76 = vector.shape_cast %75 : vector<8x1x128xf32> to vector<8x128xf32>
    %77 = vector.extract_strided_slice %55 {offsets = [0, 5, 0], sizes = [8, 1, 128], strides = [1, 1, 1]} : vector<8x8x128xf32> to vector<8x1x128xf32>
    %78 = vector.shape_cast %77 : vector<8x1x128xf32> to vector<8x128xf32>
    %79 = arith.maximumf %76, %78 : vector<8x128xf32>
    %80 = arith.addf %79, %58 : vector<8x128xf32>
    %cst_26 = arith.constant 0.000000e+00 : f32
    %81 = vector.broadcast %cst_26 : f32 to vector<8x128xf32>
    %82 = arith.maximumf %80, %81 : vector<8x128xf32>
    %83 = vector.extract_strided_slice %55 {offsets = [0, 6, 0], sizes = [8, 1, 128], strides = [1, 1, 1]} : vector<8x8x128xf32> to vector<8x1x128xf32>
    %84 = vector.shape_cast %83 : vector<8x1x128xf32> to vector<8x128xf32>
    %85 = vector.extract_strided_slice %55 {offsets = [0, 7, 0], sizes = [8, 1, 128], strides = [1, 1, 1]} : vector<8x8x128xf32> to vector<8x1x128xf32>
    %86 = vector.shape_cast %85 : vector<8x1x128xf32> to vector<8x128xf32>
    %87 = arith.maximumf %84, %86 : vector<8x128xf32>
    %88 = arith.addf %87, %58 : vector<8x128xf32>
    %cst_27 = arith.constant 0.000000e+00 : f32
    %89 = vector.broadcast %cst_27 : f32 to vector<8x128xf32>
    %90 = arith.maximumf %88, %89 : vector<8x128xf32>
    %91 = tpu.concatenate %66, %74, %82, %90 in 1 : vector<8x128xf32>, vector<8x128xf32>, vector<8x128xf32>, vector<8x128xf32> -> vector<8x512xf32>
    %92 = arith.truncf %91 : vector<8x512xf32> to vector<8x512xbf16>
    %c0_28 = arith.constant 0 : index
    %c0_29 = arith.constant 0 : index
    %93 = vector.load %arg6[%c0_28, %c0_29] : memref<512x128xbf16, #tpu.memory_space<vmem>>, vector<512x128xbf16>
    %cst_30 = arith.constant dense<0.000000e+00> : vector<8x128xf32>
    %94 = tpu.matmul %92, %93, %cst_30 {dimension_numbers = #tpu.dot_dimension_numbers<[1], [0], [0], [1], [0, 0, 1, 1], [], []>} : vector<8x512xbf16>, vector<512x128xbf16>, vector<8x128xf32> -> vector<8x128xf32>
    %c0_31 = arith.constant 0 : index
    %c0_32 = arith.constant 0 : index
    %95 = vector.load %arg7[%c0_31, %c0_32] : memref<1x128xf32, #tpu.memory_space<vmem>>, vector<1x128xf32>
    %96 = vector.broadcast %95 : vector<1x128xf32> to vector<8x128xf32>
    %97 = arith.addf %94, %96 : vector<8x128xf32>
    %cst_33 = arith.constant 0.000000e+00 : f32
    %98 = vector.broadcast %cst_33 : f32 to vector<8x128xf32>
    %99 = arith.maximumf %97, %98 : vector<8x128xf32>
    %100 = arith.truncf %99 : vector<8x128xf32> to vector<8x128xbf16>
    %c0_34 = arith.constant 0 : index
    %c0_35 = arith.constant 0 : index
    %101 = vector.load %arg8[%c0_34, %c0_35] : memref<128x128xbf16, #tpu.memory_space<vmem>>, vector<128x128xbf16>
    %cst_36 = arith.constant dense<0.000000e+00> : vector<8x128xf32>
    %102 = tpu.matmul %100, %101, %cst_36 {dimension_numbers = #tpu.dot_dimension_numbers<[1], [0], [0], [1], [0, 0, 1, 1], [], []>} : vector<8x128xbf16>, vector<128x128xbf16>, vector<8x128xf32> -> vector<8x128xf32>
    %c0_37 = arith.constant 0 : index
    %c0_38 = arith.constant 0 : index
    %103 = vector.load %arg9[%c0_37, %c0_38] : memref<1x128xf32, #tpu.memory_space<vmem>>, vector<1x128xf32>
    %104 = vector.broadcast %103 : vector<1x128xf32> to vector<8x128xf32>
    %105 = arith.addf %102, %104 : vector<8x128xf32>
    %cst_39 = arith.constant 0.000000e+00 : f32
    %106 = vector.broadcast %cst_39 : f32 to vector<8x128xf32>
    %107 = arith.maximumf %105, %106 : vector<8x128xf32>
    %108 = arith.truncf %107 : vector<8x128xf32> to vector<8x128xbf16>
    %c0_40 = arith.constant 0 : index
    %c0_41 = arith.constant 0 : index
    %109 = vector.load %arg10[%c0_40, %c0_41] : memref<128x128xbf16, #tpu.memory_space<vmem>>, vector<128x128xbf16>
    %cst_42 = arith.constant dense<0.000000e+00> : vector<8x128xf32>
    %110 = tpu.matmul %108, %109, %cst_42 {dimension_numbers = #tpu.dot_dimension_numbers<[1], [0], [0], [1], [0, 0, 1, 1], [], []>} : vector<8x128xbf16>, vector<128x128xbf16>, vector<8x128xf32> -> vector<8x128xf32>
    %c0_43 = arith.constant 0 : index
    %c0_44 = arith.constant 0 : index
    %111 = vector.load %arg11[%c0_43, %c0_44] : memref<1x128xf32, #tpu.memory_space<vmem>>, vector<1x128xf32>
    %112 = vector.broadcast %111 : vector<1x128xf32> to vector<8x128xf32>
    %113 = arith.addf %110, %112 : vector<8x128xf32>
    %c0_45 = arith.constant 0 : index
    %c0_46 = arith.constant 0 : index
    %114 = vector.load %arg12[%c0_45, %c0_46] : memref<8x128xf32, #tpu.memory_space<vmem>>, vector<8x128xf32>
    tpu.vector_store %arg12[%c0_45, %c0_46], %113 {strides = array<i32>} : memref<8x128xf32, #tpu.memory_space<vmem>>, vector<8x128xf32>,
    return
  }
  func.func @transform_0(%arg0: i32) -> (i32, i32) {
    %c0_i32 = arith.constant 0 : i32
    %c0_i32_0 = arith.constant 0 : i32
    return %arg0, %c0_i32 : i32, i32
  }
  func.func @transform_1(%arg0: i32) -> (i32, i32) {
    %c0_i32 = arith.constant 0 : i32
    %c0_i32_0 = arith.constant 0 : i32
    %c0_i32_1 = arith.constant 0 : i32
    return %c0_i32, %c0_i32_0 : i32, i32
  }
  func.func @transform_2(%arg0: i32) -> (i32, i32) {
    %c0_i32 = arith.constant 0 : i32
    %c0_i32_0 = arith.constant 0 : i32
    %c0_i32_1 = arith.constant 0 : i32
    return %c0_i32, %c0_i32_0 : i32, i32
  }
  func.func @transform_3(%arg0: i32) -> (i32, i32, i32) {
    %c0_i32 = arith.constant 0 : i32
    %c0_i32_0 = arith.constant 0 : i32
    %c0_i32_1 = arith.constant 0 : i32
    %c0_i32_2 = arith.constant 0 : i32
    return %c0_i32, %c0_i32_0, %c0_i32_1 : i32, i32, i32
  }
  func.func @transform_4(%arg0: i32) -> (i32, i32) {
    %c0_i32 = arith.constant 0 : i32
    %c0_i32_0 = arith.constant 0 : i32
    %c0_i32_1 = arith.constant 0 : i32
    return %c0_i32, %c0_i32_0 : i32, i32
  }
  func.func @transform_5(%arg0: i32) -> (i32, i32) {
    %c0_i32 = arith.constant 0 : i32
    %c0_i32_0 = arith.constant 0 : i32
    %c0_i32_1 = arith.constant 0 : i32
    return %c0_i32, %c0_i32_0 : i32, i32
  }
  func.func @transform_6(%arg0: i32) -> (i32, i32) {
    %c0_i32 = arith.constant 0 : i32
    %c0_i32_0 = arith.constant 0 : i32
    %c0_i32_1 = arith.constant 0 : i32
    return %c0_i32, %c0_i32_0 : i32, i32
  }
  func.func @transform_7(%arg0: i32) -> (i32, i32) {
    %c0_i32 = arith.constant 0 : i32
    %c0_i32_0 = arith.constant 0 : i32
    %c0_i32_1 = arith.constant 0 : i32
    return %c0_i32, %c0_i32_0 : i32, i32
  }
  func.func @transform_8(%arg0: i32) -> (i32, i32) {
    %c0_i32 = arith.constant 0 : i32
    %c0_i32_0 = arith.constant 0 : i32
    %c0_i32_1 = arith.constant 0 : i32
    return %c0_i32, %c0_i32_0 : i32, i32
  }
  func.func @transform_9(%arg0: i32) -> (i32, i32) {
    %c0_i32 = arith.constant 0 : i32
    %c0_i32_0 = arith.constant 0 : i32
    %c0_i32_1 = arith.constant 0 : i32
    return %c0_i32, %c0_i32_0 : i32, i32
  }
  func.func @transform_10(%arg0: i32) -> (i32, i32) {
    %c0_i32 = arith.constant 0 : i32
    %c0_i32_0 = arith.constant 0 : i32
    %c0_i32_1 = arith.constant 0 : i32
    return %c0_i32, %c0_i32_0 : i32, i32
  }
  func.func @transform_11(%arg0: i32) -> (i32, i32) {
    %c0_i32 = arith.constant 0 : i32
    %c0_i32_0 = arith.constant 0 : i32
    return %arg0, %c0_i32 : i32, i32
  }
}

</mosaic_0001>

<bundles_post_ra>
// kernel: cnn_forward.1
= control target key start
LH: loop header
LB: loop body
LE: loop exit
PB: predicated region body
PF: predicated region fallthrough
CT: control target
= control target key end

     0   :  { %vm739_vm0 = vcmask 1046528   ;;  %vm1099_vm1 = vcmask 1045504   ;;  %vm1322_vm2 = vcmask 1044480   ;;  %vm1545_vm3 = vcmask 1043456   ;;  %s4121_s1 = inlined_call_operand.vmem [shape: bf16[256,256], index: 1, kind: input, shape index: {}]   ;;  %s4122_s0 = inlined_call_operand.vmem [shape: bf16[256,256], index: 0, kind: input, shape index: {}]   ;;  %s4123_s3 = inlined_call_operand.vmem [shape: bf16[5,128,256], index: 3, kind: input, shape index: {}]   ;;  %s4124_s2 = inlined_call_operand.vmem [shape: f32[1,128], index: 2, kind: input, shape index: {}]   ;;  %s4125_s5 = inlined_call_operand.vmem [shape: bf16[512,128], index: 5, kind: input, shape index: {}]   ;;  %s4126_s7 = inlined_call_operand.vmem [shape: bf16[128,128], index: 7, kind: input, shape index: {}]   ;;  %s4127_s4 = inlined_call_operand.vmem [shape: f32[1,128], index: 4, kind: input, shape index: {}]   ;;  %s4128_s9 = inlined_call_operand.vmem [shape: bf16[128,128], index: 9, kind: input, shape index: {}]   ;;  %s4129_s6 = inlined_call_operand.vmem [shape: f32[1,128], index: 6, kind: input, shape index: {}]   ;;  %s4130_s8 = inlined_call_operand.vmem [shape: f32[1,128], index: 8, kind: input, shape index: {}]   ;;  %s4131_s10 = inlined_call_operand.vmem [shape: f32[1,128], index: 10, kind: input, shape index: {}]   ;;  %s4132_s11 = inlined_call_operand.vmem [shape: f32[8,128], index: 11, kind: output, shape index: {}]  }
   0x1   :  { %v2914_v0 = vld [vmem:[%s4121_s1 + $0x4] ss:$8 sps:$4 sm:$0xff]   ;;  %v2916_v1 = vld [vmem:[%s4121_s1] ss:$8 sps:$4 sm:$0xff]   ;;  %v2917_v2 = vld [vmem:[%s4121_s1 + $0x14] ss:$8 sps:$4 sm:$0xff]  }
   0x2   :  { %423 = vmatprep.subr.bf16.mxu0 %v2914_v0  ;;  %v2919_v3 = vld [vmem:[%s4121_s1 + $0x10] ss:$8 sps:$4 sm:$0xff]   ;;  %v2920_v4 = vld [vmem:[%s4121_s1 + $0x24] ss:$8 sps:$4 sm:$0xff]   ;;  %v2922_v5 = vld [vmem:[%s4121_s1 + $0x20] ss:$8 sps:$4 sm:$0xff]  }
   0x3   :  { %424 = vmatpush1.bf16.msra.mxu0 %v2916_v1  ;;  %v2923_v6 = vld [vmem:[%s4121_s1 + $0x34] ss:$8 sps:$4 sm:$0xff]   ;;  %v2925_v7 = vld [vmem:[%s4121_s1 + $0x30] ss:$8 sps:$4 sm:$0xff]   ;;  %v2926_v8 = vld [vmem:[%s4121_s1 + $0x44] ss:$8 sps:$4 sm:$0xff]  }
   0x4   :  { %425 = vmatprep.subr.bf16.mxu0 %v2917_v2  ;;  %v2928_v9 = vld [vmem:[%s4121_s1 + $0x40] ss:$8 sps:$4 sm:$0xff]   ;;  %v2929_v10 = vld [vmem:[%s4121_s1 + $0x54] ss:$8 sps:$4 sm:$0xff]   ;;  %v2931_v11 = vld [vmem:[%s4121_s1 + $0x50] ss:$8 sps:$4 sm:$0xff]  }
   0x5   :  { %v2932_v12 = vld [vmem:[%s4121_s1 + $0x64] ss:$8 sps:$4 sm:$0xff]   ;;  %v2934_v14 = vld [vmem:[%s4121_s1 + $0x60] ss:$8 sps:$4 sm:$0xff]   ;;  %v2935_v15 = vld [vmem:[%s4121_s1 + $0x74] ss:$8 sps:$4 sm:$0xff]  }
   0x6   :  { %v2964_v13 = vld [vmem:[%s4122_s0 + $0x4] ss:$8 sps:$4 sm:$0xff]   ;;  %v2937_v16 = vld [vmem:[%s4121_s1 + $0x70] ss:$8 sps:$4 sm:$0xff]   ;;  %v2940_v18 = vld [vmem:[%s4121_s1 + $0x80] ss:$8 sps:$4 sm:$0xff]  }
   0x7   :  { %426 = vmatpush1.bf16.msra.mxu0 %v2919_v3  ;;  %455 = vmatprep.mubr.bf16.mxu0 %v2964_v13  ;;  %v2938_v17 = vld [vmem:[%s4121_s1 + $0x84] ss:$8 sps:$4 sm:$0xff]   ;;  %v2941_v19 = vld [vmem:[%s4121_s1 + $0x94] ss:$8 sps:$4 sm:$0xff]   ;;  %v2943_v20 = vld [vmem:[%s4121_s1 + $0x90] ss:$8 sps:$4 sm:$0xff]  }
   0x8   :  { %427 = vmatprep.subr.bf16.mxu0 %v2920_v4  ;;  %v2944_v21 = vld [vmem:[%s4121_s1 + $0xa4] ss:$8 sps:$4 sm:$0xff]   ;;  %v2946_v22 = vld [vmem:[%s4121_s1 + $0xa0] ss:$8 sps:$4 sm:$0xff]   ;;  %v2947_v23 = vld [vmem:[%s4121_s1 + $0xb4] ss:$8 sps:$4 sm:$0xff]  }
   0x9   :  { %v2949_v24 = vld [vmem:[%s4121_s1 + $0xb0] ss:$8 sps:$4 sm:$0xff]   ;;  %v2950_v25 = vld [vmem:[%s4121_s1 + $0xc4] ss:$8 sps:$4 sm:$0xff]   ;;  %v2952_v26 = vld [vmem:[%s4121_s1 + $0xc0] ss:$8 sps:$4 sm:$0xff]  }
   0xa   :  { %v2953_v27 = vld [vmem:[%s4121_s1 + $0xd4] ss:$8 sps:$4 sm:$0xff]   ;;  %v2955_v28 = vld [vmem:[%s4121_s1 + $0xd0] ss:$8 sps:$4 sm:$0xff]   ;;  %v2956_v29 = vld [vmem:[%s4121_s1 + $0xe4] ss:$8 sps:$4 sm:$0xff]  }
   0xb   :  { %428 = vmatpush1.bf16.msra.mxu0 %v2922_v5  ;;  %v2958_v30 = vld [vmem:[%s4121_s1 + $0xe0] ss:$8 sps:$4 sm:$0xff]   ;;  %v2959_v31 = vld [vmem:[%s4121_s1 + $0xf4] ss:$8 sps:$4 sm:$0xff]   ;;  %v2961_v32 = vld [vmem:[%s4121_s1 + $0xf0] ss:$8 sps:$4 sm:$0xff]  }
   0xc   :  { %429 = vmatprep.subr.bf16.mxu0 %v2923_v6  ;;  %v2962_v33 = vld [vmem:[%s4122_s0] ss:$8 sps:$4 sm:$0xff]   ;;  %v2965_v34 = vld [vmem:[%s4122_s0 + $0x14] ss:$8 sps:$4 sm:$0xff]   ;;  %v2967_v35 = vld [vmem:[%s4122_s0 + $0x10] ss:$8 sps:$4 sm:$0xff]  }
   0xd   :  { %v2968_v36 = vld [vmem:[%s4122_s0 + $0x24] ss:$8 sps:$4 sm:$0xff]   ;;  %v2970_v37 = vld [vmem:[%s4122_s0 + $0x20] ss:$8 sps:$4 sm:$0xff]   ;;  %v2971_v38 = vld [vmem:[%s4122_s0 + $0x34] ss:$8 sps:$4 sm:$0xff]  }
   0xe   :  { %v2973_v39 = vld [vmem:[%s4122_s0 + $0x30] ss:$8 sps:$4 sm:$0xff]   ;;  %v2974_v40 = vld [vmem:[%s4122_s0 + $0x44] ss:$8 sps:$4 sm:$0xff]   ;;  %v2976_v41 = vld [vmem:[%s4122_s0 + $0x40] ss:$8 sps:$4 sm:$0xff]  }
   0xf   :  { %430 = vmatpush1.bf16.msra.mxu0 %v2925_v7  ;;  %v2977_v42 = vld [vmem:[%s4122_s0 + $0x54] ss:$8 sps:$4 sm:$0xff]   ;;  %v2979_v43 = vld [vmem:[%s4122_s0 + $0x50] ss:$8 sps:$4 sm:$0xff]   ;;  %v2980_v44 = vld [vmem:[%s4122_s0 + $0x64] ss:$8 sps:$4 sm:$0xff]  }
  0x10   :  { %431 = vmatprep.subr.bf16.mxu0 %v2926_v8  ;;  %v2982_v45 = vld [vmem:[%s4122_s0 + $0x60] ss:$8 sps:$4 sm:$0xff]   ;;  %v2983_v46 = vld [vmem:[%s4122_s0 + $0x74] ss:$8 sps:$4 sm:$0xff]   ;;  %v2985_v47 = vld [vmem:[%s4122_s0 + $0x70] ss:$8 sps:$4 sm:$0xff]  }
  0x11   :  { %v2986_v48 = vld [vmem:[%s4122_s0 + $0x84] ss:$8 sps:$4 sm:$0xff]   ;;  %v2988_v49 = vld [vmem:[%s4122_s0 + $0x80] ss:$8 sps:$4 sm:$0xff]   ;;  %v2989_v50 = vld [vmem:[%s4122_s0 + $0x94] ss:$8 sps:$4 sm:$0xff]  }
  0x12   :  { %v2991_v51 = vld [vmem:[%s4122_s0 + $0x90] ss:$8 sps:$4 sm:$0xff]   ;;  %v2992_v52 = vld [vmem:[%s4122_s0 + $0xa4] ss:$8 sps:$4 sm:$0xff]   ;;  %v2994_v53 = vld [vmem:[%s4122_s0 + $0xa0] ss:$8 sps:$4 sm:$0xff]  }
  0x13   :  { %432 = vmatpush1.bf16.msra.mxu0 %v2928_v9  ;;  %v2995_v54 = vld [vmem:[%s4122_s0 + $0xb4] ss:$8 sps:$4 sm:$0xff]   ;;  %v2997_v55 = vld [vmem:[%s4122_s0 + $0xb0] ss:$8 sps:$4 sm:$0xff]   ;;  %v2998_v56 = vld [vmem:[%s4122_s0 + $0xc4] ss:$8 sps:$4 sm:$0xff]  }
  0x14   :  { %433 = vmatprep.subr.bf16.mxu0 %v2929_v10  ;;  %v3000_v57 = vld [vmem:[%s4122_s0 + $0xc0] ss:$8 sps:$4 sm:$0xff]   ;;  %v3010_v58 = vld [vmem:[%s4123_s3 + $0x84] ss:$8 sps:$4 sm:$0xff]   ;;  %v3001_v59 = vld [vmem:[%s4122_s0 + $0xd4] ss:$8 sps:$4 sm:$0xff]  }
  0x15   :  { %v3012_v60 = vld [vmem:[%s4123_s3 + $0x80] ss:$8 sps:$4 sm:$0xff]   ;;  %873 = vmatprep.subr.bf16.mxu1 %v3010_v58  ;;  %v3013_v61 = vld [vmem:[%s4123_s3 + $0x94] ss:$8 sps:$4 sm:$0xff]   ;;  %v3015_v62 = vld [vmem:[%s4123_s3 + $0x90] ss:$8 sps:$4 sm:$0xff]  }
  0x16   :  { %874 = vmatpush1.bf16.msra.mxu1 %v3012_v60  ;;  %v3003_v63 = vld [vmem:[%s4122_s0 + $0xd0] ss:$8 sps:$4 sm:$0xff]   ;;  %v3016_v0 = vld [vmem:[%s4123_s3 + $0xa4] ss:$8 sps:$4 sm:$0xff]   ;;  %v3018_v2 = vld [vmem:[%s4123_s3 + $0xa0] ss:$8 sps:$4 sm:$0xff]  }
  0x17   :  { %434 = vmatpush1.bf16.msra.mxu0 %v2931_v11  ;;  %875 = vmatprep.subr.bf16.mxu1 %v3013_v61  ;;  %v3004_v1 = vld [vmem:[%s4122_s0 + $0xe4] ss:$8 sps:$4 sm:$0xff]   ;;  %v3019_v3 = vld [vmem:[%s4123_s3 + $0xb4] ss:$8 sps:$4 sm:$0xff]   ;;  %v3021_v4 = vld [vmem:[%s4123_s3 + $0xb0] ss:$8 sps:$4 sm:$0xff]  }
  0x18   :  { %435 = vmatprep.subr.bf16.mxu0 %v2932_v12  ;;  %v3006_v5 = vld [vmem:[%s4122_s0 + $0xe0] ss:$8 sps:$4 sm:$0xff]   ;;  %v3022_v6 = vld [vmem:[%s4123_s3 + $0xc4] ss:$8 sps:$4 sm:$0xff]   ;;  %v3007_v7 = vld [vmem:[%s4122_s0 + $0xf4] ss:$8 sps:$4 sm:$0xff]  }
  0x19   :  { %v3024_v8 = vld [vmem:[%s4123_s3 + $0xc0] ss:$8 sps:$4 sm:$0xff]   ;;  %v3025_v9 = vld [vmem:[%s4123_s3 + $0xd4] ss:$8 sps:$4 sm:$0xff]   ;;  %v3027_v10 = vld [vmem:[%s4123_s3 + $0xd0] ss:$8 sps:$4 sm:$0xff]  }
  0x1a   :  { %876 = vmatpush1.bf16.msra.mxu1 %v3015_v62  ;;  %v3009_v11 = vld [vmem:[%s4122_s0 + $0xf0] ss:$8 sps:$4 sm:$0xff]   ;;  %v3028_v12 = vld [vmem:[%s4123_s3 + $0xe4] ss:$8 sps:$4 sm:$0xff]   ;;  %v3030_v13 = vld [vmem:[%s4123_s3 + $0xe0] ss:$8 sps:$4 sm:$0xff]  }
  0x1b   :  { %436 = vmatpush1.bf16.msra.mxu0 %v2934_v14  ;;  %877 = vmatprep.subr.bf16.mxu1 %v3016_v0  ;;  %v3031_v14 = vld [vmem:[%s4123_s3 + $0xf4] ss:$8 sps:$4 sm:$0xff]   ;;  %vm1840_vm4 = vcmask 1041409   ;;  %vm1843_vm5 = vcmask 1042434   ;;  %vm1846_vm6 = vcmask 1043459   ;;  %vm1849_vm7 = vcmask 1044484  }
  0x1c   :  { %437 = vmatprep.subr.bf16.mxu0 %v2935_v15  ;;  %v3033_v15 = vld [vmem:[%s4123_s3 + $0xf0] ss:$8 sps:$4 sm:$0xff]   ;;  %vm1852_vm8 = vcmask 1045509   ;;  %vm1855_vm9 = vcmask 1046534   ;;  %vm1858_vm10 = vcmask 1047559   ;;  %vm3180_vm11 = vmmov 0  }
  0x1e   :  { %878 = vmatpush1.bf16.msra.mxu1 %v3018_v2 }
  0x1f   :  { %438 = vmatpush1.bf16.msra.mxu0 %v2937_v16  ;;  %879 = vmatprep.subr.bf16.mxu1 %v3019_v3  ;;  %v3178_v16 = vmov 0  }
  0x20   :  { %439 = vmatprep.subr.bf16.mxu0 %v2938_v17  ;;  %905 = vmatprep.mubr.bf16.mxu1 %v3178_v16  ;;  %v3036_v17 = vld [vmem:[%s4123_s3 + $0x4] ss:$8 sps:$4 sm:$0xff]  }
  0x22   :  { %880 = vmatpush1.bf16.msra.mxu1 %v3021_v4 }
  0x23   :  { %440 = vmatpush1.bf16.msra.mxu0 %v2940_v18  ;;  %881 = vmatprep.subr.bf16.mxu1 %v3022_v6 }
  0x24   :  { %441 = vmatprep.subr.bf16.mxu0 %v2941_v19 }
  0x26   :  { %882 = vmatpush1.bf16.msra.mxu1 %v3024_v8 }
  0x27   :  { %442 = vmatpush1.bf16.msra.mxu0 %v2943_v20  ;;  %883 = vmatprep.subr.bf16.mxu1 %v3025_v9 }
  0x28   :  { %443 = vmatprep.subr.bf16.mxu0 %v2944_v21 }
  0x2a   :  { %884 = vmatpush1.bf16.msra.mxu1 %v3027_v10 }
  0x2b   :  { %444 = vmatpush1.bf16.msra.mxu0 %v2946_v22  ;;  %885 = vmatprep.subr.bf16.mxu1 %v3028_v12 }
  0x2c   :  { %445 = vmatprep.subr.bf16.mxu0 %v2947_v23 }
  0x2e   :  { %886 = vmatpush1.bf16.msra.mxu1 %v3030_v13 }
  0x2f   :  { %446 = vmatpush1.bf16.msra.mxu0 %v2949_v24  ;;  %887 = vmatprep.subr.bf16.mxu1 %v3031_v14 }
  0x30   :  { %447 = vmatprep.subr.bf16.mxu0 %v2950_v25 }
  0x32   :  { %888 = vmatpush1.bf16.msra.mxu1 %v3033_v15 }
  0x33   :  { %448 = vmatpush1.bf16.msra.mxu0 %v2952_v26  ;;  %1026 = vmatprep.subr.bf16.mxu1 %v3036_v17 }
  0x34   :  { %449 = vmatprep.subr.bf16.mxu0 %v2953_v27  ;;  %v3488_v27 = vld [vmem:[%s4124_s2] ss:$0 sm:$0xff] }
  0x37   :  { %450 = vmatpush1.bf16.msra.mxu0 %v2955_v28 }
  0x38   :  { %451 = vmatprep.subr.bf16.mxu0 %v2956_v29 }
  0x3b   :  { %452 = vmatpush1.bf16.msra.mxu0 %v2958_v30 }
  0x3c   :  { %453 = vmatprep.subr.bf16.mxu0 %v2959_v31 }
  0x3f   :  { %454 = vmatpush1.bf16.msra.mxu0 %v2961_v32 }
  0x42   :  { %456 = vmatmul.mubr.bf16.vlgmr.msra.gmra.mrb[0].mxu0 %v2962_v33 }
  0x43   :  { %465 = vmatprep.mubr.bf16.mxu0 %v2965_v34 }
  0x4a   :  { %466 = vmatmul.mubr.bf16.gmra.mrb[4].mxu0 %v2967_v35 }
  0x4b   :  { %475 = vmatprep.mubr.bf16.mxu0 %v2968_v36 }
  0x52   :  { %476 = vmatmul.mubr.bf16.gmra.mrb[8].mxu0 %v2970_v37 }
  0x53   :  { %485 = vmatprep.mubr.bf16.mxu0 %v2971_v38 }
  0x5a   :  { %486 = vmatmul.mubr.bf16.gmra.mrb[12].mxu0 %v2973_v39 }
  0x5b   :  { %495 = vmatprep.mubr.bf16.mxu0 %v2974_v40 }
  0x62   :  { %496 = vmatmul.mubr.bf16.gmra.mrb[16].mxu0 %v2976_v41 }
  0x63   :  { %505 = vmatprep.mubr.bf16.mxu0 %v2977_v42 }
  0x6a   :  { %506 = vmatmul.mubr.bf16.gmra.mrb[20].mxu0 %v2979_v43 }
  0x6b   :  { %515 = vmatprep.mubr.bf16.mxu0 %v2980_v44 }
  0x72   :  { %516 = vmatmul.mubr.bf16.gmra.mrb[24].mxu0 %v2982_v45 }
  0x73   :  { %525 = vmatprep.mubr.bf16.mxu0 %v2983_v46 }
  0x7a   :  { %526 = vmatmul.mubr.bf16.gmra.mrb[28].mxu0 %v2985_v47 }
  0x7b   :  { %535 = vmatprep.mubr.bf16.mxu0 %v2986_v48 }
  0x82   :  { %536 = vmatmul.mubr.bf16.gmra.mrb[32].mxu0 %v2988_v49 }
  0x83   :  { %545 = vmatprep.mubr.bf16.mxu0 %v2989_v50 }
  0x8a   :  { %546 = vmatmul.mubr.bf16.gmra.mrb[36].mxu0 %v2991_v51 }
  0x8b   :  { %555 = vmatprep.mubr.bf16.mxu0 %v2992_v52 }
  0x92   :  { %556 = vmatmul.mubr.bf16.gmra.mrb[40].mxu0 %v2994_v53 }
  0x93   :  { %565 = vmatprep.mubr.bf16.mxu0 %v2995_v54 }
  0x9a   :  { %566 = vmatmul.mubr.bf16.gmra.mrb[44].mxu0 %v2997_v55 }
  0x9b   :  { %575 = vmatprep.mubr.bf16.mxu0 %v2998_v56 }
  0xa2   :  { %576 = vmatmul.mubr.bf16.gmra.mrb[48].mxu0 %v3000_v57 }
  0xa3   :  { %585 = vmatprep.mubr.bf16.mxu0 %v3001_v59 }
  0xaa   :  { %586 = vmatmul.mubr.bf16.gmra.mrb[52].mxu0 %v3003_v63 }
  0xab   :  { %595 = vmatprep.mubr.bf16.mxu0 %v3004_v1 }
  0xb2   :  { %596 = vmatmul.mubr.bf16.gmra.mrb[56].mxu0 %v3006_v5 }
  0xb3   :  { %605 = vmatprep.mubr.bf16.mxu0 %v3007_v7 }
  0xba   :  { %606 = vmatmul.mubr.bf16.gmra.mrb[60].mxu0 %v3009_v11 }
 0x115   :  { %v457_v18 = vpop.f32.mrb[0].mxu0 }
 0x116   :  { %v459_v19 = vpop.f32.mrb[1].mxu0 }
 0x117   :  { %v461_v20 = vpop.f32.mrb[2].mxu0 }
 0x118   :  { %v463_v21 = vpop.f32.mrb[3].mxu0 }
 0x11d   :  { %v467_v22 = vpop.f32.mrb[4].mxu0 }
 0x11e   :  { %v616_v23 = vmax.f32 %v457_v18, %v467_v22  ;;  %v469_v24 = vpop.f32.mrb[5].mxu0  ;;  %v3034_v18 = vld [vmem:[%s4123_s3] ss:$8 sps:$4 sm:$0xff]  }
 0x11f   :  { %v617_v25 = vmax.f32 %v459_v19, %v469_v24  ;;  %v471_v26 = vpop.f32.mrb[6].mxu0 }
 0x120   :  { %v618_v28 = vmax.f32 %v461_v20, %v471_v26  ;;  %v473_v29 = vpop.f32.mrb[7].mxu0 }
 0x121   :  { %v648_v30 = vmax.f32 %v616_v23, %v617_v25  ;;  %v619_v31 = vmax.f32 %v463_v21, %v473_v29  ;;  %v3039_v23 = vld [vmem:[%s4123_s3 + $0x14] ss:$8 sps:$4 sm:$0xff]  }
 0x123   :  { %v671_v32 = vadd.f32 %v3488_v27, %v648_v30  ;;  %v649_v33 = vmax.f32 %v618_v28, %v619_v31 }
 0x125   :  { %v3491_v34 = vmax.f32 %v671_v32, 0.0  ;;  %v672_v35 = vadd.f32 %v3488_v27, %v649_v33  ;;  %v477_v36 = vpop.f32.mrb[8].mxu0  ;;  %v3037_v33 = vld [vmem:[%s4123_s3 + $0x10] ss:$8 sps:$4 sm:$0xff]  }
 0x126   :  { %v479_v37 = vpop.f32.mrb[9].mxu0 }
 0x127   :  { %v688_v38 = vmax.f32 %v672_v35, 0.0  ;;  %v481_v39 = vpop.f32.mrb[10].mxu0  ;;  %v740_v41 = vrot.slane %v3491_v34, 1  ;;  %v1100_v42 = vrot.slane %v3491_v34, 2  ;;  %v1323_v43 = vrot.slane %v3491_v34, 3 }
 0x128   :  { %v483_v40 = vpop.f32.mrb[11].mxu0  ;;  %v1546_v44 = vrot.slane %v3491_v34, 4 }
 0x129   :  { %v1101_v45 = vrot.slane %v688_v38, 2  ;;  %v1324_v46 = vrot.slane %v688_v38, 3  ;;  %v1547_v47 = vrot.slane %v688_v38, 4  ;;  %v741_v48 = vrot.slane %v688_v38, 1 }
 0x12b   :  { %v742_v49 = vsel %vm739_vm0, %v740_v41, %v741_v48  ;;  %v3500_v50 = vsel %vm1099_vm1, %v1100_v42, %v1101_v45  ;;  %v3503_v51 = vsel %vm1322_vm2, %v1323_v43, %v1324_v46  ;;  %v3506_v52 = vsel %vm1545_vm3, %v1546_v44, %v1547_v47  ;;  %v3040_v42 = vld [vmem:[%s4123_s3 + $0x20] ss:$8 sps:$4 sm:$0xff]   ;;  %v3045_v43 = vld [vmem:[%s4123_s3 + $0x34] ss:$8 sps:$4 sm:$0xff]  }
 0x12d   :  { %v487_v53 = vpop.f32.mrb[12].mxu0 }
 0x12e   :  { %v620_v54 = vmax.f32 %v477_v36, %v487_v53  ;;  %v489_v55 = vpop.f32.mrb[13].mxu0  ;;  %v3043_v53 = vld [vmem:[%s4123_s3 + $0x30] ss:$8 sps:$4 sm:$0xff]  }
 0x12f   :  { %v621_v56 = vmax.f32 %v479_v37, %v489_v55  ;;  %v491_v57 = vpop.f32.mrb[14].mxu0  ;;  %v3042_v37 = vld [vmem:[%s4123_s3 + $0x24] ss:$8 sps:$4 sm:$0xff]  }
 0x130   :  { %v622_v58 = vmax.f32 %v481_v39, %v491_v57  ;;  %v493_v59 = vpop.f32.mrb[15].mxu0 }
 0x131   :  { %v650_v60 = vmax.f32 %v620_v54, %v621_v56  ;;  %v623_v61 = vmax.f32 %v483_v40, %v493_v59  ;;  %v3048_v54 = vld [vmem:[%s4123_s3 + $0x44] ss:$8 sps:$4 sm:$0xff]  }
 0x133   :  { %v673_v62 = vadd.f32 %v3488_v27, %v650_v60  ;;  %v651_v63 = vmax.f32 %v622_v58, %v623_v61 }
 0x135   :  { %v3509_v0 = vmax.f32 %v673_v62, 0.0  ;;  %v674_v1 = vadd.f32 %v3488_v27, %v651_v63  ;;  %v497_v2 = vpop.f32.mrb[16].mxu0 }
 0x136   :  { %v499_v3 = vpop.f32.mrb[17].mxu0 }
 0x137   :  { %v690_v4 = vmax.f32 %v674_v1, 0.0  ;;  %v501_v5 = vpop.f32.mrb[18].mxu0  ;;  %v703_v6 = vpack.c.bf16 %v3509_v0, %v3491_v34  ;;  %v743_v8 = vrot.slane %v3509_v0, 1  ;;  %v1103_v9 = vrot.slane %v3509_v0, 2  ;;  %v3064_v34 = vld [vmem:[%s4123_s3 + $0x120] ss:$8 sps:$4 sm:$0xff]  }
 0x138   :  { %v503_v7 = vpop.f32.mrb[19].mxu0  ;;  %v1326_v10 = vrot.slane %v3509_v0, 3  ;;  %v1549_v11 = vrot.slane %v3509_v0, 4  ;;  %v3137_v0 = vld [vmem:[%s4125_s5 + $0x18] sm:$0xff]  }
 0x139   :  { %v1104_v12 = vrot.slane %v690_v4, 2  ;;  %v1327_v13 = vrot.slane %v690_v4, 3  ;;  %v1550_v14 = vrot.slane %v690_v4, 4  ;;  %v744_v15 = vrot.slane %v690_v4, 1 }
 0x13b   :  { %v745_v17 = vsel %vm739_vm0, %v743_v8, %v744_v15  ;;  %v3523_v19 = vsel %vm1099_vm1, %v1103_v9, %v1104_v12  ;;  %v3526_v20 = vsel %vm1322_vm2, %v1326_v10, %v1327_v13  ;;  %v3529_v21 = vsel %vm1545_vm3, %v1549_v11, %v1550_v14  ;;  %v3049_v13 = vld [vmem:[%s4123_s3 + $0x50] ss:$8 sps:$4 sm:$0xff]  }
 0x13c   :  { %v772_v22 = vpack.c.bf16 %v745_v17, %v742_v49  ;;  %v1132_v24 = vpack.c.bf16 %v3523_v19, %v3500_v50  ;;  %v1355_v25 = vpack.c.bf16 %v3526_v20, %v3503_v51  ;;  %v1578_v26 = vpack.c.bf16 %v3529_v21, %v3506_v52  ;;  %v3054_v17 = vld [vmem:[%s4123_s3 + $0x64] ss:$8 sps:$4 sm:$0xff]   ;;  %v3093_v50 = vld [vmem:[%s4123_s3 + $0x1b4] ss:$8 sps:$4 sm:$0xff]   ;;  %v3091_v19 = vld [vmem:[%s4123_s3 + $0x1b0] ss:$8 sps:$4 sm:$0xff]  }
 0x13d   :  { %v507_v28 = vpop.f32.mrb[20].mxu0  ;;  %v3117_v51 = vld [vmem:[%s4123_s3 + $0x234] ss:$8 sps:$4 sm:$0xff]   ;;  %v3115_v20 = vld [vmem:[%s4123_s3 + $0x230] ss:$8 sps:$4 sm:$0xff]   ;;  %v3144_v52 = vld [vmem:[%s4125_s5 + $0xc0] sm:$0xff]  }
 0x13e   :  { %v624_v29 = vmax.f32 %v497_v2, %v507_v28  ;;  %v509_v30 = vpop.f32.mrb[21].mxu0  ;;  %906 = vmatmul.mubr.bf16.vlgmr.msra.gmra.mrb[0].mxu1 %v772_v22  ;;  %v3046_v2 = vld [vmem:[%s4123_s3 + $0x40] ss:$8 sps:$4 sm:$0xff]  }
 0x13f   :  { %v625_v31 = vmax.f32 %v499_v3, %v509_v30  ;;  %v511_v32 = vpop.f32.mrb[22].mxu0  ;;  %915 = vmatprep.mubr.bf16.mxu1 %v3178_v16  ;;  %1027 = vmatpush1.bf16.msra.mxu1 %v3034_v18  ;;  %v3057_v30 = vld [vmem:[%s4123_s3 + $0x74] ss:$8 sps:$4 sm:$0xff]   ;;  %v3145_v21 = vld [vmem:[%s4125_s5 + $0x80] sm:$0xff]  }
 0x140   :  { %v626_v35 = vmax.f32 %v501_v5, %v511_v32  ;;  %v513_v36 = vpop.f32.mrb[23].mxu0  ;;  %1028 = vmatprep.subr.bf16.mxu1 %v3039_v23 }
 0x141   :  { %v652_v38 = vmax.f32 %v624_v29, %v625_v31  ;;  %v627_v39 = vmax.f32 %v503_v7, %v513_v36  ;;  %v3051_v7 = vld [vmem:[%s4123_s3 + $0x54] ss:$8 sps:$4 sm:$0xff]   ;;  %v3052_v29 = vld [vmem:[%s4123_s3 + $0x60] ss:$8 sps:$4 sm:$0xff]  }
 0x143   :  { %v675_v40 = vadd.f32 %v3488_v27, %v652_v38  ;;  %v653_v41 = vmax.f32 %v626_v35, %v627_v39  ;;  %1029 = vmatpush1.bf16.msra.mxu1 %v3037_v33  ;;  %v3055_v38 = vld [vmem:[%s4123_s3 + $0x70] ss:$8 sps:$4 sm:$0xff]   ;;  %v3060_v39 = vld [vmem:[%s4123_s3 + $0x104] ss:$8 sps:$4 sm:$0xff]  }
 0x144   :  { %1030 = vmatprep.subr.bf16.mxu1 %v3042_v37 }
 0x145   :  { %v3554_v44 = vmax.f32 %v675_v40, 0.0  ;;  %v676_v45 = vadd.f32 %v3488_v27, %v653_v41  ;;  %v517_v46 = vpop.f32.mrb[24].mxu0 }
 0x146   :  { %v519_v47 = vpop.f32.mrb[25].mxu0 }
 0x147   :  { %v692_v48 = vmax.f32 %v676_v45, 0.0  ;;  %v521_v49 = vpop.f32.mrb[26].mxu0  ;;  %1031 = vmatpush1.bf16.msra.mxu1 %v3040_v42  ;;  %v746_v56 = vrot.slane %v3554_v44, 1  ;;  %v1106_v57 = vrot.slane %v3554_v44, 2  ;;  %v1329_v58 = vrot.slane %v3554_v44, 3 }
 0x148   :  { %v523_v55 = vpop.f32.mrb[27].mxu0  ;;  %1032 = vmatprep.subr.bf16.mxu1 %v3045_v43  ;;  %v1552_v59 = vrot.slane %v3554_v44, 4 }
 0x149   :  { %v747_v60 = vrot.slane %v692_v48, 1  ;;  %v1107_v61 = vrot.slane %v692_v48, 2  ;;  %v1330_v62 = vrot.slane %v692_v48, 3  ;;  %v1553_v63 = vrot.slane %v692_v48, 4 }
 0x14b   :  { %v748_v1 = vsel %vm739_vm0, %v746_v56, %v747_v60  ;;  %1033 = vmatpush1.bf16.msra.mxu1 %v3043_v53  ;;  %v3572_v3 = vsel %vm1099_vm1, %v1106_v57, %v1107_v61  ;;  %v3575_v4 = vsel %vm1322_vm2, %v1329_v58, %v1330_v62  ;;  %v3578_v5 = vsel %vm1545_vm3, %v1552_v59, %v1553_v63 }
 0x14c   :  { %1034 = vmatprep.subr.bf16.mxu1 %v3048_v54 }
 0x14d   :  { %v527_v8 = vpop.f32.mrb[28].mxu0 }
 0x14e   :  { %v628_v9 = vmax.f32 %v517_v46, %v527_v8  ;;  %v529_v10 = vpop.f32.mrb[29].mxu0 }
 0x14f   :  { %v629_v11 = vmax.f32 %v519_v47, %v529_v10  ;;  %v531_v12 = vpop.f32.mrb[30].mxu0  ;;  %1035 = vmatpush1.bf16.msra.mxu1 %v3046_v2 }
 0x150   :  { %v630_v14 = vmax.f32 %v521_v49, %v531_v12  ;;  %v533_v15 = vpop.f32.mrb[31].mxu0  ;;  %1036 = vmatprep.subr.bf16.mxu1 %v3051_v7 }
 0x151   :  { %v654_v18 = vmax.f32 %v628_v9, %v629_v11  ;;  %v631_v22 = vmax.f32 %v523_v55, %v533_v15 }
 0x153   :  { %v677_v23 = vadd.f32 %v3488_v27, %v654_v18  ;;  %v655_v28 = vmax.f32 %v630_v14, %v631_v22  ;;  %1037 = vmatpush1.bf16.msra.mxu1 %v3049_v13 }
 0x154   :  { %1038 = vmatprep.subr.bf16.mxu1 %v3054_v17 }
 0x155   :  { %v3596_v31 = vmax.f32 %v677_v23, 0.0  ;;  %v678_v32 = vadd.f32 %v3488_v27, %v655_v28  ;;  %v537_v33 = vpop.f32.mrb[32].mxu0 }
 0x156   :  { %v539_v35 = vpop.f32.mrb[33].mxu0 }
 0x157   :  { %v694_v36 = vmax.f32 %v678_v32, 0.0  ;;  %v541_v37 = vpop.f32.mrb[34].mxu0  ;;  %1039 = vmatpush1.bf16.msra.mxu1 %v3052_v29  ;;  %v704_v40 = vpack.c.bf16 %v3596_v31, %v3554_v44  ;;  %v749_v42 = vrot.slane %v3596_v31, 1  ;;  %v1109_v43 = vrot.slane %v3596_v31, 2  ;;  %v3075_v44 = vld [vmem:[%s4123_s3 + $0x154] ss:$8 sps:$4 sm:$0xff]  }
 0x158   :  { %v543_v41 = vpop.f32.mrb[35].mxu0  ;;  %1040 = vmatprep.subr.bf16.mxu1 %v3057_v30  ;;  %v1332_v45 = vrot.slane %v3596_v31, 3  ;;  %v1555_v46 = vrot.slane %v3596_v31, 4  ;;  %v3073_v31 = vld [vmem:[%s4123_s3 + $0x150] ss:$8 sps:$4 sm:$0xff]  }
 0x159   :  { %v750_v47 = vrot.slane %v694_v36, 1  ;;  %v1110_v48 = vrot.slane %v694_v36, 2  ;;  %v1333_v49 = vrot.slane %v694_v36, 3  ;;  %v1556_v53 = vrot.slane %v694_v36, 4 }
 0x15b   :  { %v751_v54 = vsel %vm739_vm0, %v749_v42, %v750_v47  ;;  %1041 = vmatpush1.bf16.msra.mxu1 %v3055_v38  ;;  %v3613_v55 = vsel %vm1099_vm1, %v1109_v43, %v1110_v48  ;;  %v3616_v56 = vsel %vm1322_vm2, %v1332_v45, %v1333_v49  ;;  %v3619_v57 = vsel %vm1545_vm3, %v1555_v46, %v1556_v53 }
 0x15c   :  { %v773_v58 = vpack.c.bf16 %v751_v54, %v748_v1  ;;  %1233 = vmatprep.subr.bf16.mxu1 %v3060_v39  ;;  %v1133_v59 = vpack.c.bf16 %v3613_v55, %v3572_v3  ;;  %v1356_v60 = vpack.c.bf16 %v3616_v56, %v3575_v4  ;;  %v1579_v61 = vpack.c.bf16 %v3619_v57, %v3578_v5  ;;  %v3099_v3 = vld [vmem:[%s4123_s3 + $0x1d4] ss:$8 sps:$4 sm:$0xff]   ;;  %v3097_v55 = vld [vmem:[%s4123_s3 + $0x1d0] ss:$8 sps:$4 sm:$0xff]  }
 0x15d   :  { %v547_v62 = vpop.f32.mrb[36].mxu0  ;;  %v3123_v4 = vld [vmem:[%s4123_s3 + $0x254] ss:$8 sps:$4 sm:$0xff]   ;;  %v3121_v56 = vld [vmem:[%s4123_s3 + $0x250] ss:$8 sps:$4 sm:$0xff]  }
 0x15e   :  { %v632_v63 = vmax.f32 %v537_v33, %v547_v62  ;;  %v549_v2 = vpop.f32.mrb[37].mxu0  ;;  %916 = vmatmul.mubr.bf16.gmra.mrb[4].mxu1 %v773_v58  ;;  %v3148_v5 = vld [vmem:[%s4125_s5 + $0xd0] sm:$0xff]  }
 0x15f   :  { %v633_v7 = vmax.f32 %v539_v35, %v549_v2  ;;  %v551_v8 = vpop.f32.mrb[38].mxu0  ;;  %925 = vmatprep.mubr.bf16.mxu1 %v3178_v16  ;;  %v3149_v57 = vld [vmem:[%s4125_s5 + $0x90] sm:$0xff]  }
 0x160   :  { %v634_v9 = vmax.f32 %v541_v37, %v551_v8  ;;  %v553_v1 = vpop.f32.mrb[39].mxu0 }
 0x161   :  { %v656_v10 = vmax.f32 %v632_v63, %v633_v7  ;;  %v635_v11 = vmax.f32 %v543_v41, %v553_v1 }
 0x163   :  { %v679_v12 = vadd.f32 %v3488_v27, %v656_v10  ;;  %v657_v13 = vmax.f32 %v634_v9, %v635_v11 }
 0x165   :  { %v3629_v14 = vmax.f32 %v679_v12, 0.0  ;;  %v680_v15 = vadd.f32 %v3488_v27, %v657_v13  ;;  %v557_v17 = vpop.f32.mrb[40].mxu0 }
 0x166   :  { %v559_v18 = vpop.f32.mrb[41].mxu0 }
 0x167   :  { %v696_v22 = vmax.f32 %v680_v15, 0.0  ;;  %v561_v23 = vpop.f32.mrb[42].mxu0  ;;  %v752_v29 = vrot.slane %v3629_v14, 1  ;;  %v1112_v30 = vrot.slane %v3629_v14, 2  ;;  %v1335_v32 = vrot.slane %v3629_v14, 3 }
 0x168   :  { %v563_v28 = vpop.f32.mrb[43].mxu0  ;;  %v1558_v33 = vrot.slane %v3629_v14, 4 }
 0x169   :  { %v753_v35 = vrot.slane %v696_v22, 1  ;;  %v1113_v36 = vrot.slane %v696_v22, 2  ;;  %v1336_v37 = vrot.slane %v696_v22, 3  ;;  %v1559_v38 = vrot.slane %v696_v22, 4 }
 0x16b   :  { %v754_v39 = vsel %vm739_vm0, %v752_v29, %v753_v35  ;;  %v3638_v41 = vsel %vm1099_vm1, %v1112_v30, %v1113_v36  ;;  %v3641_v42 = vsel %vm1322_vm2, %v1335_v32, %v1336_v37  ;;  %v3644_v43 = vsel %vm1545_vm3, %v1558_v33, %v1559_v38 }
 0x16d   :  { %v567_v45 = vpop.f32.mrb[44].mxu0 }
 0x16e   :  { %v636_v46 = vmax.f32 %v557_v17, %v567_v45  ;;  %v569_v47 = vpop.f32.mrb[45].mxu0 }
 0x16f   :  { %v637_v48 = vmax.f32 %v559_v18, %v569_v47  ;;  %v571_v49 = vpop.f32.mrb[46].mxu0 }
 0x170   :  { %v638_v53 = vmax.f32 %v561_v23, %v571_v49  ;;  %v573_v54 = vpop.f32.mrb[47].mxu0 }
 0x171   :  { %v658_v58 = vmax.f32 %v636_v46, %v637_v48  ;;  %v639_v62 = vmax.f32 %v563_v28, %v573_v54 }
 0x173   :  { %v681_v63 = vadd.f32 %v3488_v27, %v658_v58  ;;  %v659_v2 = vmax.f32 %v638_v53, %v639_v62 }
 0x175   :  { %v3647_v7 = vmax.f32 %v681_v63, 0.0  ;;  %v682_v8 = vadd.f32 %v3488_v27, %v659_v2  ;;  %v577_v9 = vpop.f32.mrb[48].mxu0 }
 0x176   :  { %v579_v1 = vpop.f32.mrb[49].mxu0 }
 0x177   :  { %v698_v10 = vmax.f32 %v682_v8, 0.0  ;;  %v581_v11 = vpop.f32.mrb[50].mxu0  ;;  %v705_v12 = vpack.c.bf16 %v3647_v7, %v3629_v14  ;;  %v755_v15 = vrot.slane %v3647_v7, 1  ;;  %v1115_v17 = vrot.slane %v3647_v7, 2  ;;  %v3081_v14 = vld [vmem:[%s4123_s3 + $0x174] ss:$8 sps:$4 sm:$0xff]  }
 0x178   :  { %v583_v13 = vpop.f32.mrb[51].mxu0  ;;  %v1338_v18 = vrot.slane %v3647_v7, 3  ;;  %v1561_v22 = vrot.slane %v3647_v7, 4  ;;  %v3079_v7 = vld [vmem:[%s4123_s3 + $0x170] ss:$8 sps:$4 sm:$0xff]  }
 0x179   :  { %v756_v23 = vrot.slane %v698_v10, 1  ;;  %v1116_v28 = vrot.slane %v698_v10, 2  ;;  %v1339_v29 = vrot.slane %v698_v10, 3  ;;  %v1562_v30 = vrot.slane %v698_v10, 4 }
 0x17b   :  { %v757_v32 = vsel %vm739_vm0, %v755_v15, %v756_v23  ;;  %v3658_v33 = vsel %vm1099_vm1, %v1115_v17, %v1116_v28  ;;  %v3661_v35 = vsel %vm1322_vm2, %v1338_v18, %v1339_v29  ;;  %v3664_v36 = vsel %vm1545_vm3, %v1561_v22, %v1562_v30 }
 0x17c   :  { %v774_v37 = vpack.c.bf16 %v757_v32, %v754_v39  ;;  %v1134_v38 = vpack.c.bf16 %v3658_v33, %v3638_v41  ;;  %v1357_v45 = vpack.c.bf16 %v3661_v35, %v3641_v42  ;;  %v1580_v46 = vpack.c.bf16 %v3664_v36, %v3644_v43  ;;  %v3105_v41 = vld [vmem:[%s4123_s3 + $0x1f4] ss:$8 sps:$4 sm:$0xff]   ;;  %v3103_v33 = vld [vmem:[%s4123_s3 + $0x1f0] ss:$8 sps:$4 sm:$0xff]  }
 0x17d   :  { %v587_v47 = vpop.f32.mrb[52].mxu0  ;;  %v3129_v42 = vld [vmem:[%s4123_s3 + $0x274] ss:$8 sps:$4 sm:$0xff]   ;;  %v3127_v35 = vld [vmem:[%s4123_s3 + $0x270] ss:$8 sps:$4 sm:$0xff]  }
 0x17e   :  { %v640_v48 = vmax.f32 %v577_v9, %v587_v47  ;;  %v589_v49 = vpop.f32.mrb[53].mxu0  ;;  %926 = vmatmul.mubr.bf16.gmra.mrb[8].mxu1 %v774_v37  ;;  %v3143_v43 = vld [vmem:[%s4125_s5 + $0x30] sm:$0xff]   ;;  %v3150_v36 = vld [vmem:[%s4125_s5 + $0xd8] sm:$0xff]  }
 0x17f   :  { %v641_v53 = vmax.f32 %v579_v1, %v589_v49  ;;  %v591_v54 = vpop.f32.mrb[54].mxu0  ;;  %935 = vmatprep.mubr.bf16.mxu1 %v3178_v16 }
 0x180   :  { %v642_v58 = vmax.f32 %v581_v11, %v591_v54  ;;  %v593_v62 = vpop.f32.mrb[55].mxu0 }
 0x181   :  { %v660_v39 = vmax.f32 %v640_v48, %v641_v53  ;;  %v643_v63 = vmax.f32 %v583_v13, %v593_v62 }
 0x183   :  { %v683_v2 = vadd.f32 %v3488_v27, %v660_v39  ;;  %v661_v8 = vmax.f32 %v642_v58, %v643_v63 }
 0x185   :  { %v3674_v10 = vmax.f32 %v683_v2, 0.0  ;;  %v684_v15 = vadd.f32 %v3488_v27, %v661_v8  ;;  %v597_v17 = vpop.f32.mrb[56].mxu0 }
 0x186   :  { %v599_v18 = vpop.f32.mrb[57].mxu0 }
 0x187   :  { %v700_v9 = vmax.f32 %v684_v15, 0.0  ;;  %v601_v22 = vpop.f32.mrb[58].mxu0  ;;  %v758_v1 = vrot.slane %v3674_v10, 1  ;;  %v1118_v28 = vrot.slane %v3674_v10, 2  ;;  %v1341_v11 = vrot.slane %v3674_v10, 3 }
 0x188   :  { %v603_v23 = vpop.f32.mrb[59].mxu0  ;;  %v1564_v13 = vrot.slane %v3674_v10, 4 }
 0x189   :  { %v759_v29 = vrot.slane %v700_v9, 1  ;;  %v1119_v30 = vrot.slane %v700_v9, 2  ;;  %v1342_v32 = vrot.slane %v700_v9, 3  ;;  %v1565_v37 = vrot.slane %v700_v9, 4 }
 0x18b   :  { %v760_v47 = vsel %vm739_vm0, %v758_v1, %v759_v29  ;;  %v3683_v48 = vsel %vm1099_vm1, %v1118_v28, %v1119_v30  ;;  %v3686_v49 = vsel %vm1322_vm2, %v1341_v11, %v1342_v32  ;;  %v3689_v53 = vsel %vm1545_vm3, %v1564_v13, %v1565_v37 }
 0x18d   :  { %v607_v54 = vpop.f32.mrb[60].mxu0 }
 0x18e   :  { %v644_v58 = vmax.f32 %v597_v17, %v607_v54  ;;  %v609_v62 = vpop.f32.mrb[61].mxu0 }
 0x18f   :  { %v645_v39 = vmax.f32 %v599_v18, %v609_v62  ;;  %v611_v63 = vpop.f32.mrb[62].mxu0 }
 0x190   :  { %v646_v2 = vmax.f32 %v601_v22, %v611_v63  ;;  %v613_v8 = vpop.f32.mrb[63].mxu0 }
 0x191   :  { %v662_v15 = vmax.f32 %v644_v58, %v645_v39  ;;  %v647_v9 = vmax.f32 %v603_v23, %v613_v8 }
 0x193   :  { %v685_v1 = vadd.f32 %v3488_v27, %v662_v15  ;;  %v663_v29 = vmax.f32 %v646_v2, %v647_v9 }
 0x195   :  { %v3692_v28 = vmax.f32 %v685_v1, 0.0  ;;  %v686_v11 = vadd.f32 %v3488_v27, %v663_v29  ;;  %v3130_v1 = vld [vmem:[%s4125_s5 + $0x40] sm:$0xff]  }
 0x196   :  { %v3058_v29 = vld [vmem:[%s4123_s3 + $0x100] ss:$8 sps:$4 sm:$0xff]   ;;  %2745 = vmatprep.subr.bf16.mxu0 %v3130_v1  ;;  %v3072_v1 = vld [vmem:[%s4123_s3 + $0x144] ss:$8 sps:$4 sm:$0xff]  }
 0x197   :  { %v702_v30 = vmax.f32 %v686_v11, 0.0  ;;  %v706_v13 = vpack.c.bf16 %v3692_v28, %v3674_v10  ;;  %v761_v17 = vrot.slane %v3692_v28, 1  ;;  %v1121_v18 = vrot.slane %v3692_v28, 2  ;;  %v3132_v11 = vld [vmem:[%s4125_s5 + $0x48] sm:$0xff]   ;;  %v3087_v10 = vld [vmem:[%s4123_s3 + $0x194] ss:$8 sps:$4 sm:$0xff]  }
 0x198   :  { %v1344_v22 = vrot.slane %v3692_v28, 3  ;;  %v1567_v32 = vrot.slane %v3692_v28, 4  ;;  %v3085_v28 = vld [vmem:[%s4123_s3 + $0x190] ss:$8 sps:$4 sm:$0xff]  }
 0x199   :  { %v762_v23 = vrot.slane %v702_v30, 1  ;;  %v1122_v37 = vrot.slane %v702_v30, 2  ;;  %v1345_v54 = vrot.slane %v702_v30, 3  ;;  %v1568_v58 = vrot.slane %v702_v30, 4  ;;  %v3133_v30 = vld [vmem:[%s4125_s5 + $0x8] sm:$0xff]  }
 0x19b   :  { %v763_v62 = vsel %vm739_vm0, %v761_v17, %v762_v23  ;;  %v3703_v27 = vsel %vm1099_vm1, %v1121_v18, %v1122_v37  ;;  %v3706_v39 = vsel %vm1322_vm2, %v1344_v22, %v1345_v54  ;;  %v3709_v63 = vsel %vm1545_vm3, %v1567_v32, %v1568_v58  ;;  %v3063_v17 = vld [vmem:[%s4123_s3 + $0x114] ss:$8 sps:$4 sm:$0xff]   ;;  %v3061_v22 = vld [vmem:[%s4123_s3 + $0x110] ss:$8 sps:$4 sm:$0xff]   ;;  %v3066_v37 = vld [vmem:[%s4123_s3 + $0x124] ss:$8 sps:$4 sm:$0xff]  }
 0x19c   :  { %v775_v2 = vpack.c.bf16 %v763_v62, %v760_v47  ;;  %v1135_v8 = vpack.c.bf16 %v3703_v27, %v3683_v48  ;;  %v1358_v15 = vpack.c.bf16 %v3706_v39, %v3686_v49  ;;  %v1581_v9 = vpack.c.bf16 %v3709_v63, %v3689_v53  ;;  %v3131_v47 = vld [vmem:[%s4125_s5] sm:$0xff]   ;;  %v3134_v18 = vld [vmem:[%s4125_s5 + $0x50] sm:$0xff]   ;;  %v3136_v23 = vld [vmem:[%s4125_s5 + $0x58] sm:$0xff]  }
 0x19d   :  { %2746 = vmatpush3.bf16.msra.mxu0 %v3131_v47  ;;  %v3135_v32 = vld [vmem:[%s4125_s5 + $0x10] sm:$0xff]   ;;  %v3138_v54 = vld [vmem:[%s4125_s5 + $0x60] sm:$0xff]   ;;  %v3141_v47 = vld [vmem:[%s4125_s5 + $0x28] sm:$0xff]  }
 0x19e   :  { %936 = vmatmul.mubr.bf16.gmra.mrb[12].mxu1 %v775_v2  ;;  %2747 = vmatprep.subr.bf16.mxu0 %v3132_v11  ;;  %v3139_v58 = vld [vmem:[%s4125_s5 + $0x20] sm:$0xff]   ;;  %v3067_v62 = vld [vmem:[%s4123_s3 + $0x130] ss:$8 sps:$4 sm:$0xff]   ;;  %v3140_v2 = vld [vmem:[%s4125_s5 + $0x68] sm:$0xff]  }
 0x19f   :  { %1058 = vmatprep.mubr.bf16.mxu1 %v3178_v16  ;;  %v3076_v11 = vld [vmem:[%s4123_s3 + $0x160] ss:$8 sps:$4 sm:$0xff]   ;;  %v3111_v48 = vld [vmem:[%s4123_s3 + $0x214] ss:$8 sps:$4 sm:$0xff]   ;;  %v3109_v27 = vld [vmem:[%s4123_s3 + $0x210] ss:$8 sps:$4 sm:$0xff]  }
 0x1a0   :  { %v3155_v49 = vld [vmem:[%s4125_s5 + $0xa0] sm:$0xff]   ;;  %v3156_v53 = vld [vmem:[%s4125_s5 + $0xe8] sm:$0xff]   ;;  %v3158_v63 = vld [vmem:[%s4125_s5 + $0xf0] sm:$0xff]  }
 0x1a1   :  { %2748 = vmatpush3.bf16.msra.mxu0 %v3133_v30  ;;  %v3082_v30 = vld [vmem:[%s4123_s3 + $0x180] ss:$8 sps:$4 sm:$0xff]  }
 0x1a2   :  { %2749 = vmatprep.subr.bf16.mxu0 %v3134_v18  ;;  %v3094_v18 = vld [vmem:[%s4123_s3 + $0x1c0] ss:$8 sps:$4 sm:$0xff]  }
 0x1a3   :  { %v3157_v39 = vld [vmem:[%s4125_s5 + $0xa8] sm:$0xff]  }
 0x1a5   :  { %2750 = vmatpush3.bf16.msra.mxu0 %v3135_v32  ;;  %v3106_v32 = vld [vmem:[%s4123_s3 + $0x200] ss:$8 sps:$4 sm:$0xff]  }
 0x1a6   :  { %1059 = vmatmul.mubr.bf16.vlgmr.msra.gmra.mrb[0].mxu1 %v703_v6  ;;  %v3069_v6 = vld [vmem:[%s4123_s3 + $0x134] ss:$8 sps:$4 sm:$0xff]   ;;  %2751 = vmatprep.subr.bf16.mxu0 %v3136_v23  ;;  %v3112_v23 = vld [vmem:[%s4123_s3 + $0x220] ss:$8 sps:$4 sm:$0xff]  }
 0x1a7   :  { %1234 = vmatpush1.bf16.msra.mxu1 %v3058_v29  ;;  %1068 = vmatprep.mubr.bf16.mxu1 %v3178_v16  ;;  %v3070_v29 = vld [vmem:[%s4123_s3 + $0x140] ss:$8 sps:$4 sm:$0xff]  }
 0x1a8   :  { %1235 = vmatprep.subr.bf16.mxu1 %v3063_v17  ;;  %v3088_v17 = vld [vmem:[%s4123_s3 + $0x1a0] ss:$8 sps:$4 sm:$0xff]  }
 0x1a9   :  { %2752 = vmatpush3.bf16.msra.mxu0 %v3137_v0  ;;  %v3153_v0 = vld [vmem:[%s4125_s5 + $0x38] sm:$0xff]  }
 0x1aa   :  { %2753 = vmatprep.subr.bf16.mxu0 %v3138_v54  ;;  %v3161_v54 = vld [vmem:[%s4125_s5 + $0xb8] sm:$0xff]  }
 0x1ab   :  { %1236 = vmatpush1.bf16.msra.mxu1 %v3061_v22  ;;  %v3100_v22 = vld [vmem:[%s4123_s3 + $0x1e0] ss:$8 sps:$4 sm:$0xff]  }
 0x1ac   :  { %1237 = vmatprep.subr.bf16.mxu1 %v3066_v37  ;;  %v3118_v37 = vld [vmem:[%s4123_s3 + $0x240] ss:$8 sps:$4 sm:$0xff]  }
 0x1ad   :  { %2754 = vmatpush3.bf16.msra.mxu0 %v3139_v58  ;;  %v3179_v58 = vmov 0.0  }
 0x1ae   :  { %1069 = vmatmul.mubr.bf16.gmra.mrb[4].mxu1 %v704_v40  ;;  %2755 = vmatprep.subr.bf16.mxu0 %v3140_v2  ;;  %v3078_v40 = vld [vmem:[%s4123_s3 + $0x164] ss:$8 sps:$4 sm:$0xff]  }
 0x1af   :  { %1238 = vmatpush1.bf16.msra.mxu1 %v3064_v34  ;;  %1078 = vmatprep.mubr.bf16.mxu1 %v3178_v16  ;;  %v3124_v34 = vld [vmem:[%s4123_s3 + $0x260] ss:$8 sps:$4 sm:$0xff]  }
 0x1b0   :  { %1239 = vmatprep.subr.bf16.mxu1 %v3069_v6  ;;  %v3160_v6 = vld [vmem:[%s4125_s5 + $0xf8] sm:$0xff]  }
 0x1b1   :  { %2756 = vmatpush3.bf16.msra.mxu0 %v3141_v47 }
 0x1b3   :  { %1240 = vmatpush1.bf16.msra.mxu1 %v3067_v62 }
 0x1b4   :  { %1241 = vmatprep.subr.bf16.mxu1 %v3072_v1 }
 0x1b6   :  { %1079 = vmatmul.mubr.bf16.gmra.mrb[8].mxu1 %v705_v12  ;;  %v3084_v12 = vld [vmem:[%s4123_s3 + $0x184] ss:$8 sps:$4 sm:$0xff]  }
 0x1b7   :  { %1242 = vmatpush1.bf16.msra.mxu1 %v3070_v29  ;;  %1088 = vmatprep.mubr.bf16.mxu1 %v3178_v16 }
 0x1b8   :  { %1243 = vmatprep.subr.bf16.mxu1 %v3075_v44 }
 0x1bb   :  { %1244 = vmatpush1.bf16.msra.mxu1 %v3073_v31 }
 0x1bc   :  { %1245 = vmatprep.subr.bf16.mxu1 %v3078_v40  ;;  %v4023_v40 = vld [vmem:[%s4127_s4] ss:$0 sm:$0xff] }
 0x1be   :  { %1089 = vmatmul.mubr.bf16.gmra.mrb[12].mxu1 %v706_v13  ;;  %v3090_v13 = vld [vmem:[%s4123_s3 + $0x1a4] ss:$8 sps:$4 sm:$0xff]  }
 0x1bf   :  { %1246 = vmatpush1.bf16.msra.mxu1 %v3076_v11  ;;  %1265 = vmatprep.mubr.bf16.mxu1 %v3178_v16 }
 0x1c0   :  { %1247 = vmatprep.subr.bf16.mxu1 %v3081_v14 }
 0x1c3   :  { %1248 = vmatpush1.bf16.msra.mxu1 %v3079_v7 }
 0x1c4   :  { %1456 = vmatprep.subr.bf16.mxu1 %v3084_v12 }
 0x1c6   :  { %1266 = vmatmul.mubr.bf16.vlgmr.msra.gmra.mrb[0].mxu1 %v1132_v24  ;;  %v3096_v24 = vld [vmem:[%s4123_s3 + $0x1c4] ss:$8 sps:$4 sm:$0xff]  }
 0x1c7   :  { %1457 = vmatpush1.bf16.msra.mxu1 %v3082_v30  ;;  %1275 = vmatprep.mubr.bf16.mxu1 %v3178_v16 }
 0x1c8   :  { %1458 = vmatprep.subr.bf16.mxu1 %v3087_v10 }
 0x1cb   :  { %1459 = vmatpush1.bf16.msra.mxu1 %v3085_v28 }
 0x1cc   :  { %1460 = vmatprep.subr.bf16.mxu1 %v3090_v13 }
 0x1ce   :  { %1276 = vmatmul.mubr.bf16.gmra.mrb[4].mxu1 %v1133_v59  ;;  %v3102_v59 = vld [vmem:[%s4123_s3 + $0x1e4] ss:$8 sps:$4 sm:$0xff]  }
 0x1cf   :  { %1461 = vmatpush1.bf16.msra.mxu1 %v3088_v17  ;;  %1285 = vmatprep.mubr.bf16.mxu1 %v3178_v16 }
 0x1d0   :  { %1462 = vmatprep.subr.bf16.mxu1 %v3093_v50 }
 0x1d3   :  { %1463 = vmatpush1.bf16.msra.mxu1 %v3091_v19 }
 0x1d4   :  { %1464 = vmatprep.subr.bf16.mxu1 %v3096_v24 }
 0x1d6   :  { %1286 = vmatmul.mubr.bf16.gmra.mrb[8].mxu1 %v1134_v38  ;;  %v3108_v38 = vld [vmem:[%s4123_s3 + $0x204] ss:$8 sps:$4 sm:$0xff]  }
 0x1d7   :  { %1465 = vmatpush1.bf16.msra.mxu1 %v3094_v18  ;;  %1295 = vmatprep.mubr.bf16.mxu1 %v3178_v16 }
 0x1d8   :  { %1466 = vmatprep.subr.bf16.mxu1 %v3099_v3 }
 0x1db   :  { %1467 = vmatpush1.bf16.msra.mxu1 %v3097_v55 }
 0x1dc   :  { %1468 = vmatprep.subr.bf16.mxu1 %v3102_v59 }
 0x1de   :  { %1296 = vmatmul.mubr.bf16.gmra.mrb[12].mxu1 %v1135_v8  ;;  %v3114_v8 = vld [vmem:[%s4123_s3 + $0x224] ss:$8 sps:$4 sm:$0xff]  }
 0x1df   :  { %1469 = vmatpush1.bf16.msra.mxu1 %v3100_v22  ;;  %1488 = vmatprep.mubr.bf16.mxu1 %v3178_v16 }
 0x1e0   :  { %1470 = vmatprep.subr.bf16.mxu1 %v3105_v41 }
 0x1e3   :  { %1471 = vmatpush1.bf16.msra.mxu1 %v3103_v33 }
 0x1e4   :  { %1679 = vmatprep.subr.bf16.mxu1 %v3108_v38 }
 0x1e6   :  { %1489 = vmatmul.mubr.bf16.vlgmr.msra.gmra.mrb[0].mxu1 %v1355_v25  ;;  %v3120_v25 = vld [vmem:[%s4123_s3 + $0x244] ss:$8 sps:$4 sm:$0xff]  }
 0x1e7   :  { %1680 = vmatpush1.bf16.msra.mxu1 %v3106_v32  ;;  %1498 = vmatprep.mubr.bf16.mxu1 %v3178_v16 }
 0x1e8   :  { %1681 = vmatprep.subr.bf16.mxu1 %v3111_v48 }
 0x1eb   :  { %1682 = vmatpush1.bf16.msra.mxu1 %v3109_v27 }
 0x1ec   :  { %1683 = vmatprep.subr.bf16.mxu1 %v3114_v8 }
 0x1ee   :  { %1499 = vmatmul.mubr.bf16.gmra.mrb[4].mxu1 %v1356_v60  ;;  %v3126_v60 = vld [vmem:[%s4123_s3 + $0x264] ss:$8 sps:$4 sm:$0xff]  }
 0x1ef   :  { %1684 = vmatpush1.bf16.msra.mxu1 %v3112_v23  ;;  %1508 = vmatprep.mubr.bf16.mxu1 %v3178_v16 }
 0x1f0   :  { %1685 = vmatprep.subr.bf16.mxu1 %v3117_v51 }
 0x1f3   :  { %1686 = vmatpush1.bf16.msra.mxu1 %v3115_v20 }
 0x1f4   :  { %1687 = vmatprep.subr.bf16.mxu1 %v3120_v25 }
 0x1f6   :  { %1509 = vmatmul.mubr.bf16.gmra.mrb[8].mxu1 %v1357_v45  ;;  %v3151_v45 = vld [vmem:[%s4125_s5 + $0x98] sm:$0xff]  }
 0x1f7   :  { %1688 = vmatpush1.bf16.msra.mxu1 %v3118_v37  ;;  %1518 = vmatprep.mubr.bf16.mxu1 %v3178_v16 }
 0x1f8   :  { %1689 = vmatprep.subr.bf16.mxu1 %v3123_v4 }
 0x1fb   :  { %1690 = vmatpush1.bf16.msra.mxu1 %v3121_v56 }
 0x1fc   :  { %1691 = vmatprep.subr.bf16.mxu1 %v3126_v60 }
 0x1fe   :  { %1519 = vmatmul.mubr.bf16.gmra.mrb[12].mxu1 %v1358_v15  ;;  %v3159_v15 = vld [vmem:[%s4125_s5 + $0xb0] sm:$0xff]  }
 0x1ff   :  { %1692 = vmatpush1.bf16.msra.mxu1 %v3124_v34  ;;  %1711 = vmatprep.mubr.bf16.mxu1 %v3178_v16 }
 0x200   :  { %1693 = vmatprep.subr.bf16.mxu1 %v3129_v42 }
 0x203   :  { %1694 = vmatpush1.bf16.msra.mxu1 %v3127_v35 }
 0x204   :  { %2767 = vmatprep.subr.bf16.mxu1 %v3144_v52 }
 0x206   :  { %1712 = vmatmul.mubr.bf16.vlgmr.msra.gmra.mrb[0].mxu1 %v1578_v26  ;;  %v3146_v26 = vld [vmem:[%s4125_s5 + $0xc8] sm:$0xff]  }
 0x207   :  { %1721 = vmatprep.mubr.bf16.mxu1 %v3178_v16  ;;  %2768 = vmatpush3.bf16.msra.mxu1 %v3145_v21 }
 0x208   :  { %2769 = vmatprep.subr.bf16.mxu1 %v3146_v26 }
 0x20e   :  { %1722 = vmatmul.mubr.bf16.gmra.mrb[4].mxu1 %v1579_v61  ;;  %v3142_v61 = vld [vmem:[%s4125_s5 + $0x70] sm:$0xff]  }
 0x20f   :  { %1731 = vmatprep.mubr.bf16.mxu1 %v3178_v16  ;;  %2757 = vmatprep.subr.bf16.mxu0 %v3142_v61 }
 0x210   :  { %2758 = vmatpush3.bf16.msra.mxu0 %v3143_v43 }
 0x216   :  { %1732 = vmatmul.mubr.bf16.gmra.mrb[8].mxu1 %v1580_v46  ;;  %v3154_v46 = vld [vmem:[%s4125_s5 + $0xe0] sm:$0xff]  }
 0x217   :  { %1741 = vmatprep.mubr.bf16.mxu1 %v3178_v16  ;;  %v3147_v16 = vld [vmem:[%s4125_s5 + $0x88] sm:$0xff]  }
 0x218   :  { %2770 = vmatpush3.bf16.msra.mxu1 %v3147_v16 }
 0x219   :  { %2771 = vmatprep.subr.bf16.mxu1 %v3148_v5 }
 0x21c   :  { %2772 = vmatpush3.bf16.msra.mxu1 %v3149_v57 }
 0x21d   :  { %2773 = vmatprep.subr.bf16.mxu1 %v3150_v36 }
 0x21e   :  { %1742 = vmatmul.mubr.bf16.gmra.mrb[12].mxu1 %v1581_v9  ;;  %v3152_v9 = vld [vmem:[%s4125_s5 + $0x78] sm:$0xff]  }
 0x21f   :  { %2759 = vmatprep.subr.bf16.mxu0 %v3152_v9 }
 0x220   :  { %2774 = vmatpush3.bf16.msra.mxu1 %v3151_v45  ;;  %2760 = vmatpush3.bf16.msra.mxu0 %v3153_v0 }
 0x221   :  { %2775 = vmatprep.subr.bf16.mxu1 %v3154_v46  ;;  %2807 = vmatprep.subr.bf16.mxu0 %v3179_v58 }
 0x224   :  { %2776 = vmatpush3.bf16.msra.mxu1 %v3155_v49 }
 0x225   :  { %2777 = vmatprep.subr.bf16.mxu1 %v3156_v53 }
 0x228   :  { %2778 = vmatpush3.bf16.msra.mxu1 %v3157_v39 }
 0x229   :  { %2779 = vmatprep.subr.bf16.mxu1 %v3158_v63 }
 0x22c   :  { %2780 = vmatpush3.bf16.msra.mxu1 %v3159_v15 }
 0x22d   :  { %2781 = vmatprep.subr.bf16.mxu1 %v3160_v6 }
 0x230   :  { %2782 = vmatpush3.bf16.msra.mxu1 %v3161_v54 }
 0x231   :  { %2827 = vmatprep.subr.bf16.mxu1 %v3179_v58 }
 0x2d9   :  { %v1713_v62 = vpop.f32.mrb[0].mxu1 }
 0x2da   :  { %v1715_v2 = vpop.f32.mrb[1].mxu1 }
 0x2db   :  { %v1768_v1 = vmax.f32 %v1713_v62, %v1715_v2  ;;  %v1717_v47 = vpop.f32.mrb[2].mxu1 }
 0x2dc   :  { %v1719_v29 = vpop.f32.mrb[3].mxu1 }
 0x2dd   :  { %v1791_v44 = vrot.slane %v1768_v1, 1  ;;  %v1769_v31 = vmax.f32 %v1717_v47, %v1719_v29 }
 0x2df   :  { %v1807_v11 = vmax.f32 %v1768_v1, %v1791_v44  ;;  %v1792_v14 = vrot.slane %v1769_v31, 1 }
 0x2e1   :  { %v1815_v7 = vadd.f32 %v4023_v40, %v1807_v11  ;;  %v1808_v12 = vmax.f32 %v1769_v31, %v1792_v14  ;;  %v1723_v30 = vpop.f32.mrb[4].mxu1 }
 0x2e2   :  { %v1725_v10 = vpop.f32.mrb[5].mxu1 }
 0x2e3   :  { %v1823_v28 = vmax.f32 %v1815_v7, 0.0  ;;  %v1816_v13 = vadd.f32 %v4023_v40, %v1808_v12  ;;  %v1770_v17 = vmax.f32 %v1723_v30, %v1725_v10  ;;  %v1727_v50 = vpop.f32.mrb[6].mxu1 }
 0x2e4   :  { %v1729_v19 = vpop.f32.mrb[7].mxu1 }
 0x2e5   :  { %v1861_v24 = vrot.slane %v1823_v28, 2  ;;  %v1824_v18 = vmax.f32 %v1816_v13, 0.0  ;;  %v1876_v3 = vrot.slane %v1823_v28, 4  ;;  %v1891_v55 = vrot.slane %v1823_v28, 6 }
 0x2e6   :  { %v1793_v59 = vrot.slane %v1770_v17, 1  ;;  %v1771_v22 = vmax.f32 %v1727_v50, %v1729_v19 }
 0x2e7   :  { %v1839_v41 = vrot.slane %v1824_v18, 7  ;;  %v1862_v33 = vrot.slane %v1824_v18, 1  ;;  %v1877_v38 = vrot.slane %v1824_v18, 3  ;;  %v1892_v32 = vrot.slane %v1824_v18, 5 }
 0x2e8   :  { %v1809_v48 = vmax.f32 %v1770_v17, %v1793_v59  ;;  %v1794_v27 = vrot.slane %v1771_v22, 1 }
 0x2e9   :  { %v1841_v8 = vsel %vm1840_vm4, %v1839_v41, %v1823_v28  ;;  %v1878_v23 = vsel %vm1840_vm4, %v1877_v38, %v1876_v3  ;;  %v1893_v51 = vsel %vm1840_vm4, %v1892_v32, %v1891_v55  ;;  %v1863_v20 = vsel %vm1840_vm4, %v1862_v33, %v1861_v24  ;;  %v1733_v25 = vpop.f32.mrb[8].mxu1 }
 0x2ea   :  { %v1817_v37 = vadd.f32 %v4023_v40, %v1809_v48  ;;  %v1810_v4 = vmax.f32 %v1771_v22, %v1794_v27  ;;  %v1735_v56 = vpop.f32.mrb[9].mxu1 }
 0x2eb   :  { %v1772_v60 = vmax.f32 %v1733_v25, %v1735_v56  ;;  %v1737_v34 = vpop.f32.mrb[10].mxu1 }
 0x2ec   :  { %v1825_v42 = vmax.f32 %v1817_v37, 0.0  ;;  %v1818_v35 = vadd.f32 %v4023_v40, %v1810_v4  ;;  %v1739_v52 = vpop.f32.mrb[11].mxu1 }
 0x2ed   :  { %v1795_v21 = vrot.slane %v1772_v60, 1  ;;  %v1773_v26 = vmax.f32 %v1737_v34, %v1739_v52 }
 0x2ee   :  { %v1842_v16 = vrot.slane %v1825_v42, 6  ;;  %v1864_v5 = vsel %vm1843_vm5, %v1825_v42, %v1863_v20  ;;  %v1879_v57 = vrot.slane %v1825_v42, 2  ;;  %v1894_v61 = vrot.slane %v1825_v42, 4 }
 0x2ef   :  { %v1826_v43 = vmax.f32 %v1818_v35, 0.0  ;;  %v1811_v36 = vmax.f32 %v1772_v60, %v1795_v21  ;;  %v1796_v45 = vrot.slane %v1773_v26, 1 }
 0x2f0   :  { %v1844_v46 = vsel %vm1843_vm5, %v1842_v16, %v1841_v8  ;;  %v1880_v49 = vsel %vm1843_vm5, %v1879_v57, %v1878_v23  ;;  %v1895_v53 = vsel %vm1843_vm5, %v1894_v61, %v1893_v51 }
 0x2f1   :  { %v1845_v39 = vrot.slane %v1826_v43, 5  ;;  %v1865_v63 = vrot.slane %v1826_v43, 7  ;;  %v1881_v15 = vrot.slane %v1826_v43, 1  ;;  %v1896_v9 = vrot.slane %v1826_v43, 3  ;;  %v1743_v0 = vpop.f32.mrb[12].mxu1 }
 0x2f2   :  { %v1819_v6 = vadd.f32 %v4023_v40, %v1811_v36  ;;  %v1812_v54 = vmax.f32 %v1773_v26, %v1796_v45  ;;  %v1745_v62 = vpop.f32.mrb[13].mxu1 }
 0x2f3   :  { %v1847_v2 = vsel %vm1846_vm6, %v1845_v39, %v1844_v46  ;;  %v1882_v1 = vsel %vm1846_vm6, %v1881_v15, %v1880_v49  ;;  %v1774_v47 = vmax.f32 %v1743_v0, %v1745_v62  ;;  %v1747_v29 = vpop.f32.mrb[14].mxu1  ;;  %v1866_v44 = vsel %vm1846_vm6, %v1865_v63, %v1864_v5  ;;  %v3162_v46 = vld [vmem:[%s4126_s7] sm:$0xff]   ;;  %v3164_v39 = vld [vmem:[%s4126_s7 + $0x10] sm:$0xff]   ;;  %v3165_v63 = vld [vmem:[%s4126_s7 + $0x18] sm:$0xff]  }
 0x2f4   :  { %v1827_v31 = vmax.f32 %v1819_v6, 0.0  ;;  %v1820_v11 = vadd.f32 %v4023_v40, %v1812_v54  ;;  %v1749_v14 = vpop.f32.mrb[15].mxu1  ;;  %v1897_v7 = vsel %vm1846_vm6, %v1896_v9, %v1895_v53  ;;  %v3163_v53 = vld [vmem:[%s4126_s7 + $0x8] sm:$0xff]   ;;  %v3166_v15 = vld [vmem:[%s4126_s7 + $0x20] sm:$0xff]   ;;  %v3168_v0 = vld [vmem:[%s4126_s7 + $0x30] sm:$0xff]  }
 0x2f5   :  { %v1797_v12 = vrot.slane %v1774_v47, 1  ;;  %v1775_v30 = vmax.f32 %v1747_v29, %v1749_v14  ;;  %v3167_v9 = vld [vmem:[%s4126_s7 + $0x28] sm:$0xff]   ;;  %v3169_v6 = vld [vmem:[%s4126_s7 + $0x38] sm:$0xff]   ;;  %v3170_v54 = vld [vmem:[%s4128_s9] sm:$0xff]  }
 0x2f6   :  { %v1848_v10 = vrot.slane %v1827_v31, 4  ;;  %v1867_v28 = vrot.slane %v1827_v31, 6  ;;  %v1883_v13 = vsel %vm1849_vm7, %v1827_v31, %v1882_v1  ;;  %v1898_v17 = vrot.slane %v1827_v31, 2  ;;  %v3171_v62 = vld [vmem:[%s4128_s9 + $0x8] sm:$0xff]   ;;  %v3173_v1 = vld [vmem:[%s4128_s9 + $0x18] sm:$0xff]  }
 0x2f7   :  { %v1828_v50 = vmax.f32 %v1820_v11, 0.0  ;;  %v1813_v19 = vmax.f32 %v1774_v47, %v1797_v12  ;;  %v1798_v24 = vrot.slane %v1775_v30, 1  ;;  %v3174_v47 = vld [vmem:[%s4128_s9 + $0x20] sm:$0xff]   ;;  %v3175_v29 = vld [vmem:[%s4128_s9 + $0x28] sm:$0xff]  }
 0x2f8   :  { %v1850_v18 = vsel %vm1849_vm7, %v1848_v10, %v1847_v2  ;;  %v1868_v3 = vsel %vm1849_vm7, %v1867_v28, %v1866_v44  ;;  %v1899_v55 = vsel %vm1849_vm7, %v1898_v17, %v1897_v7  ;;  %v3172_v2 = vld [vmem:[%s4128_s9 + $0x10] sm:$0xff]   ;;  %v2694_v11 = vld [vmem:[%s4129_s6] ss:$0 sm:$0xff] }
 0x2f9   :  { %v1851_v59 = vrot.slane %v1828_v50, 3  ;;  %v1869_v22 = vrot.slane %v1828_v50, 5  ;;  %v1884_v41 = vrot.slane %v1828_v50, 7  ;;  %v1900_v33 = vrot.slane %v1828_v50, 1 }
 0x2fa   :  { %v1821_v38 = vadd.f32 %v4023_v40, %v1813_v19  ;;  %v1814_v32 = vmax.f32 %v1775_v30, %v1798_v24 }
 0x2fb   :  { %v1870_v48 = vsel %vm1852_vm8, %v1869_v22, %v1868_v3  ;;  %v1901_v27 = vsel %vm1852_vm8, %v1900_v33, %v1899_v55  ;;  %v1853_v8 = vsel %vm1852_vm8, %v1851_v59, %v1850_v18  ;;  %v1885_v23 = vsel %vm1852_vm8, %v1884_v41, %v1883_v13  ;;  %v3176_v3 = vld [vmem:[%s4128_s9 + $0x30] sm:$0xff]   ;;  %v3177_v55 = vld [vmem:[%s4128_s9 + $0x38] sm:$0xff]   ;;  %v2727_v59 = vld [vmem:[%s4130_s8] ss:$0 sm:$0xff] }
 0x2fc   :  { %v1829_v51 = vmax.f32 %v1821_v38, 0.0  ;;  %v1822_v20 = vadd.f32 %v4023_v40, %v1814_v32 }
 0x2fe   :  { %v1854_v25 = vrot.slane %v1829_v51, 2  ;;  %v1886_v37 = vrot.slane %v1829_v51, 6  ;;  %v1830_v4 = vmax.f32 %v1822_v20, 0.0  ;;  %v1871_v56 = vrot.slane %v1829_v51, 4 }
 0x2ff   :  { %v1902_v60 = vsel %vm1855_vm9, %v1829_v51, %v1901_v27 }
 0x300   :  { %v1857_v34 = vrot.slane %v1830_v4, 1  ;;  %v1888_v42 = vrot.slane %v1830_v4, 5  ;;  %v1872_v35 = vsel %vm1855_vm9, %v1871_v56, %v1870_v48  ;;  %v1873_v52 = vrot.slane %v1830_v4, 3 }
 0x301   :  { %v1903_v21 = vrot.slane %v1830_v4, 7  ;;  %v1856_v26 = vsel %vm1855_vm9, %v1854_v25, %v1853_v8  ;;  %v1887_v16 = vsel %vm1855_vm9, %v1886_v37, %v1885_v23 }
 0x302   :  { %v1874_v5 = vsel %vm1858_vm10, %v1873_v52, %v1872_v35  ;;  %v1859_v57 = vsel %vm1858_vm10, %v1857_v34, %v1856_v26  ;;  %v1889_v61 = vsel %vm1858_vm10, %v1888_v42, %v1887_v16 }
 0x303   :  { %v1907_v43 = vpack.c.bf16 %v1874_v5, %v1874_v5  ;;  %v1904_v36 = vsel %vm1858_vm10, %v1903_v21, %v1902_v60  ;;  %v1906_v40 = vpack.c.bf16 %v1859_v57, %v1859_v57  ;;  %v1908_v45 = vpack.c.bf16 %v1889_v61, %v1889_v61 }
 0x304   :  { %v1909_v49 = vpack.c.bf16 %v1904_v36, %v1904_v36 }
 0x305   :  { %2205 = vmatprep.mubr.bf16.mxu0 %v1907_v43 }
 0x306   :  { %2245 = vmatprep.mubr.bf16.mxu1 %v1909_v49  ;;  %2206 = vmatmul.mubr.bf16.vlgmr.msra.gmra.mrb[64].mxu0 %v1906_v40 }
 0x307   :  { %2246 = vmatmul.mubr.bf16.vlgmr.msra.gmra.mrb[16].mxu1 %v1908_v45  ;;  %2808 = vmatpush3.bf16.msra.mxu0 %v3162_v46 }
 0x308   :  { %2809 = vmatprep.subr.bf16.mxu0 %v3179_v58  ;;  %2823 = vmatprep.mubr.msk.bf16.mxu0 %vm3180_vm11, %v3179_v58 }
 0x309   :  { %2843 = vmatprep.mubr.msk.bf16.mxu1 %vm3180_vm11, %v3179_v58  ;;  %2828 = vmatpush3.bf16.msra.mxu1 %v3170_v54 }
 0x30a   :  { %2829 = vmatprep.subr.bf16.mxu1 %v3179_v58 }
 0x30b   :  { %2810 = vmatpush3.bf16.msra.mxu0 %v3163_v53 }
 0x30c   :  { %2811 = vmatprep.subr.bf16.mxu0 %v3179_v58 }
 0x30d   :  { %2830 = vmatpush3.bf16.msra.mxu1 %v3171_v62 }
 0x30e   :  { %2831 = vmatprep.subr.bf16.mxu1 %v3179_v58 }
 0x30f   :  { %2812 = vmatpush3.bf16.msra.mxu0 %v3164_v39 }
 0x310   :  { %2813 = vmatprep.subr.bf16.mxu0 %v3179_v58 }
 0x311   :  { %2832 = vmatpush3.bf16.msra.mxu1 %v3172_v2 }
 0x312   :  { %2833 = vmatprep.subr.bf16.mxu1 %v3179_v58 }
 0x313   :  { %2814 = vmatpush3.bf16.msra.mxu0 %v3165_v63 }
 0x314   :  { %2815 = vmatprep.subr.bf16.mxu0 %v3179_v58 }
 0x315   :  { %2834 = vmatpush3.bf16.msra.mxu1 %v3173_v1 }
 0x316   :  { %2835 = vmatprep.subr.bf16.mxu1 %v3179_v58 }
 0x317   :  { %2816 = vmatpush3.bf16.msra.mxu0 %v3166_v15 }
 0x318   :  { %2817 = vmatprep.subr.bf16.mxu0 %v3179_v58 }
 0x319   :  { %2836 = vmatpush3.bf16.msra.mxu1 %v3174_v47 }
 0x31a   :  { %2837 = vmatprep.subr.bf16.mxu1 %v3179_v58 }
 0x31b   :  { %2818 = vmatpush3.bf16.msra.mxu0 %v3167_v9 }
 0x31c   :  { %2819 = vmatprep.subr.bf16.mxu0 %v3179_v58 }
 0x31d   :  { %2838 = vmatpush3.bf16.msra.mxu1 %v3175_v29 }
 0x31e   :  { %2839 = vmatprep.subr.bf16.mxu1 %v3179_v58 }
 0x31f   :  { %2820 = vmatpush3.bf16.msra.mxu0 %v3168_v0 }
 0x320   :  { %2821 = vmatprep.subr.bf16.mxu0 %v3179_v58 }
 0x321   :  { %2840 = vmatpush3.bf16.msra.mxu1 %v3176_v3 }
 0x322   :  { %2841 = vmatprep.subr.bf16.mxu1 %v3179_v58  ;;  %v2736_v58 = vld [vmem:[%s4131_s10] ss:$0 sm:$0xff] }
 0x323   :  { %2822 = vmatpush3.bf16.msra.mxu0 %v3169_v6 }
 0x325   :  { %2842 = vmatpush3.bf16.msra.mxu1 %v3177_v55 }
 0x3d9   :  { %v2761_v44 = vpop.f32.mrb[64].mxu0 }
 0x3da   :  { %v2783_v31 = vpop.f32.mrb[16].mxu1  ;;  %v2762_v14 = vpop.f32.mrb[65].mxu0 }
 0x3db   :  { %v2763_v7 = vadd.f32 %v2762_v14, %v2761_v44  ;;  %v2784_v12 = vpop.f32.mrb[17].mxu1  ;;  %v2764_v30 = vpop.f32.mrb[66].mxu0 }
 0x3dc   :  { %v2785_v10 = vadd.f32 %v2784_v12, %v2783_v31  ;;  %v2786_v28 = vpop.f32.mrb[18].mxu1  ;;  %v2765_v13 = vpop.f32.mrb[67].mxu0 }
 0x3dd   :  { %v2208_v17 = vadd.f32 %v2763_v7, %v2694_v11  ;;  %v2787_v50 = vpop.f32.mrb[19].mxu1 }
 0x3df   :  { %v2248_v19 = vadd.f32 %v2785_v10, %v2208_v17 }
 0x3e1   :  { %v2253_v24 = vmax.f32 %v2248_v19, 0.0 }
 0x3e3   :  { %v2254_v18 = vpack.c.bf16 %v2253_v24, %v2253_v24 }
 0x3e5   :  { %2824 = vmatmul.mubr.bf16.vlgmr.msra.gmra.mrb[68].mxu0 %v2254_v18 }
 0x4b8   :  { %v2360_v22 = vpop.f32.mrb[68].mxu0 }
 0x4b9   :  { %v2361_v41 = vadd.f32 %v2727_v59, %v2360_v22  ;;  %v2825_v33 = vpop.f32.mrb[69].mxu0 }
 0x4ba   :  { %v2363_v38 = vpop.f32.mrb[70].mxu0 }
 0x4bb   :  { %v2366_v32 = vmax.f32 %v2361_v41, 0.0  ;;  %v2826_v48 = vpop.f32.mrb[71].mxu0 }
 0x4bd   :  { %v2367_v27 = vpack.c.bf16 %v2366_v32, %v2366_v32 }
 0x4bf   :  { %2844 = vmatmul.mubr.bf16.vlgmr.msra.gmra.mrb[20].mxu1 %v2367_v27 }
 0x592   :  { %v2473_v8 = vpop.f32.mrb[20].mxu1 }
 0x593   :  { %v2474_v23 = vadd.f32 %v2736_v58, %v2473_v8  ;;  %v2845_v51 = vpop.f32.mrb[21].mxu1 }
 0x594   :  { %v2476_v20 = vpop.f32.mrb[22].mxu1 }
 0x595   :  { %2479 = vst [vmem:[%s4132_s11] sm:$0xff] %v2474_v23  ;;  %v2846_v25 = vpop.f32.mrb[23].mxu1 }

</bundles_post_ra>
